<compile_context>
chip_gen: v7x
topology: tpu7x:2x2x1
jax: 0.10.0
libtpu: 0.0.40
codegen_flags: <defaults>
</compile_context>

<pallas_src>
import math
import jax
import jax.numpy as jnp
from jax import lax
from jax.experimental import pallas as pl
from jax.experimental.pallas import tpu as pltpu  # noqa: F401  (kept for TPU backend import parity)

# ---- problem sizes (small, consistent with the module) ----
B = 2          # batch
L = 8          # sequence length
E = 32         # hidden_dim (embed_dim)
H = 4          # num_heads
D = E // H     # head_dim
DROPOUT = 0.1  # TODO(synk): dropout (p=0.1) not applied — eval-mode semantics.


def mha_kernel(x_ref, maskb_ref,
               wq_ref, wk_ref, wv_ref,
               bq_ref, bk_ref, bv_ref,
               wout_ref, bout_ref,
               out_ref, attw_ref):
    """Whole batch in one step. Weights arrive pre-transposed & per-head split,
    so every slice in here is on a leading (non-lane) dim or sublane-aligned."""
    x = x_ref[...]                                   # (B*L, E)

    out_acc = jnp.zeros((B * L, E), jnp.float32)
    attw_acc = jnp.zeros((B * L, L), jnp.float32)

    for h in range(H):                               # static unroll, H = 4
        # Per-head projections; 1/sqrt(D) already folded into wq/bq.
        q_h = jnp.dot(x, wq_ref[h], preferred_element_type=jnp.float32) + bq_ref[h]
        k_h = jnp.dot(x, wk_ref[h], preferred_element_type=jnp.float32) + bk_ref[h]
        v_h = jnp.dot(x, wv_ref[h], preferred_element_type=jnp.float32) + bv_ref[h]

        p_blocks = []
        ctx_blocks = []
        for b in range(B):                           # static unroll, B = 2
            # Sublane-aligned row slices (offsets are multiples of 8) — free.
            qb = q_h[b * L:(b + 1) * L, :]           # (L, D)
            kb = k_h[b * L:(b + 1) * L, :]           # (L, D)
            vb = v_h[b * L:(b + 1) * L, :]           # (L, D)

            # scores = q @ k^T without an explicit transpose (contract last dims)
            s = lax.dot_general(qb, kb, (((1,), (1,)), ((), ())),
                                preferred_element_type=jnp.float32)   # (L, L)
            s = s + maskb_ref[b]                     # (1, L) additive key-padding bias
            s = s - jnp.max(s, axis=-1, keepdims=True)
            e = jnp.exp(s)
            inv = pl.reciprocal(jnp.sum(e, axis=-1, keepdims=True), approx=True)
            p = e * inv                              # softmax over keys

            p_blocks.append(p)
            ctx_blocks.append(jnp.dot(p, vb, preferred_element_type=jnp.float32))

        # Stack the two batch blocks along sublanes (cheap) and fold this head's
        # contribution through its slice of the (pre-transposed) out_proj weight.
        ctx_h = jnp.concatenate(ctx_blocks, axis=0)                 # (B*L, D)
        out_acc = out_acc + jnp.dot(ctx_h, wout_ref[h],
                                    preferred_element_type=jnp.float32)
        attw_acc = attw_acc + jnp.concatenate(p_blocks, axis=0)     # (B*L, L)

    out_ref[...] = out_acc + bout_ref[...]           # single flat-slab store
    attw_ref[...] = attw_acc * (1.0 / H)             # average over heads


def text_module_forward(text, padding_mask, params):
    """text: (B, L, E) f32, padding_mask: (B, L) bool (True = pad)."""
    w_in, b_in, w_out, b_out = params
    scale = 1.0 / math.sqrt(D)

    # ---- one-time parameter layout prep (outside the kernel) ----
    # transpose + per-head split so the kernel never transposes or lane-slices.
    def head_major_t(w):                     # (E_out, E_in) -> (H, E_in, D)
        return w.T.reshape(E, H, D).transpose(1, 0, 2)

    wq = head_major_t(w_in[:E] * scale)      # scale folded into Q weight
    wk = head_major_t(w_in[E:2 * E])
    wv = head_major_t(w_in[2 * E:])
    bq = (b_in[:E] * scale).reshape(H, 1, D)  # and into Q bias
    bk = b_in[E:2 * E].reshape(H, 1, D)
    bv = b_in[2 * E:].reshape(H, 1, D)
    wout = w_out.T.reshape(H, D, E)          # rows h*D:(h+1)*D of W_out^T -> head h
    bout = b_out.reshape(1, E)

    mask_bias = jnp.where(padding_mask, -1e9, 0.0).astype(jnp.float32)
    mask_bias = mask_bias.reshape(B, 1, L)   # additive, (B, 1, L)

    x_flat = text.reshape(B * L, E)

    out_flat, attw_flat = pl.pallas_call(
        mha_kernel,
        out_shape=(jax.ShapeDtypeStruct((B * L, E), jnp.float32),
                   jax.ShapeDtypeStruct((B * L, L), jnp.float32)),
    )(x_flat, mask_bias, wq, wk, wv, bq, bk, bv, wout, bout)

    return out_flat.reshape(B, L, E), attw_flat.reshape(B, L, L)


def reference_forward(text, padding_mask, params):
    """Pure-JAX reference matching nn.MultiheadAttention eval forward."""
    w_in, b_in, w_out, b_out = params
    qkv = jnp.einsum("ble,fe->blf", text, w_in) + b_in          # (B, L, 3E)
    q, k, v = qkv[..., :E], qkv[..., E:2 * E], qkv[..., 2 * E:]

    def split(t):  # (B, L, E) -> (B, H, L, D)
        return t.reshape(B, L, H, D).transpose(0, 2, 1, 3)

    qh, kh, vh = split(q), split(k), split(v)
    s = jnp.einsum("bhld,bhmd->bhlm", qh, kh) / math.sqrt(D)
    bias = jnp.where(padding_mask, -1e9, 0.0)[:, None, None, :]
    p = jax.nn.softmax(s + bias, axis=-1)
    ctx = jnp.einsum("bhlm,bhmd->bhld", p, vh)
    ctx = ctx.transpose(0, 2, 1, 3).reshape(B, L, E)
    out = jnp.einsum("ble,fe->blf", ctx, w_out) + b_out
    return out, p.mean(axis=1)


if __name__ == "__main__":
    key = jax.random.PRNGKey(0)
    k1, k2, k3, k4, k5 = jax.random.split(key, 5)

    # deterministic synthetic parameters (shapes from nn.MultiheadAttention)
    w_in = jax.random.normal(k1, (3 * E, E), jnp.float32) * (1.0 / math.sqrt(E))
    b_in = jax.random.normal(k2, (3 * E,), jnp.float32) * 0.02
    w_out = jax.random.normal(k3, (E, E), jnp.float32) * (1.0 / math.sqrt(E))
    b_out = jax.random.normal(k4, (E,), jnp.float32) * 0.02
    params = (w_in, b_in, w_out, b_out)

    # inputs
    text = jax.random.normal(k5, (B, L, E), jnp.float32)
    # pad the tail of each sequence differently (True = ignore)
    padding_mask = jnp.array(
        [[False] * 6 + [True] * 2,
         [False] * 8], dtype=bool)  # (B, L)

    out, attw = text_module_forward(text, padding_mask, params)
    out = jax.block_until_ready(out)
    attw = jax.block_until_ready(attw)

    ref_out, ref_attw = reference_forward(text, padding_mask, params)
    # Tolerances account for the approximate EUP reciprocal used for the
    # softmax denominator (relative error << 1e-2).
    assert jnp.allclose(out, ref_out, atol=1e-2, rtol=1e-2), "attn output mismatch"
    assert jnp.allclose(attw, ref_attw, atol=1e-2, rtol=1e-2), "attn weights mismatch"

    print("KERNEL_OK")
</pallas_src>

<mosaic_0001>
module attributes {stable_mosaic.version = 11 : i64} {
  func.func @mha_kernel(%arg0: memref<16x32xf32, #tpu.memory_space<vmem>>, %arg1: memref<2x1x8xf32, #tpu.memory_space<vmem>>, %arg2: memref<4x32x8xf32, #tpu.memory_space<vmem>>, %arg3: memref<4x32x8xf32, #tpu.memory_space<vmem>>, %arg4: memref<4x32x8xf32, #tpu.memory_space<vmem>>, %arg5: memref<4x1x8xf32, #tpu.memory_space<vmem>>, %arg6: memref<4x1x8xf32, #tpu.memory_space<vmem>>, %arg7: memref<4x1x8xf32, #tpu.memory_space<vmem>>, %arg8: memref<4x8x32xf32, #tpu.memory_space<vmem>>, %arg9: memref<1x32xf32, #tpu.memory_space<vmem>>, %arg10: memref<16x32xf32, #tpu.memory_space<vmem>>, %arg11: memref<16x8xf32, #tpu.memory_space<vmem>>) attributes {dimension_semantics = [], scalar_prefetch = 0 : i64, scratch_operands = 0 : i64, tpu.core_type = #tpu.core_type<tc>} {
    %c0 = arith.constant 0 : index
    %c0_0 = arith.constant 0 : index
    %0 = vector.load %arg0[%c0, %c0_0] : memref<16x32xf32, #tpu.memory_space<vmem>>, vector<16x32xf32>
    %cst = arith.constant 0.000000e+00 : f32
    %1 = vector.broadcast %cst : f32 to vector<16x32xf32>
    %cst_1 = arith.constant 0.000000e+00 : f32
    %2 = vector.broadcast %cst_1 : f32 to vector<16x8xf32>
    %c0_2 = arith.constant 0 : index
    %c0_3 = arith.constant 0 : index
    %c0_4 = arith.constant 0 : index
    %3 = vector.load %arg2[%c0_2, %c0_3, %c0_4] : memref<4x32x8xf32, #tpu.memory_space<vmem>>, vector<1x32x8xf32>
    %4 = vector.shape_cast %3 : vector<1x32x8xf32> to vector<32x8xf32>
    %cst_5 = arith.constant dense<0.000000e+00> : vector<16x8xf32>
    %5 = tpu.matmul %0, %4, %cst_5 {dimension_numbers = #tpu.dot_dimension_numbers<[1], [0], [0], [1], [0, 0, 1, 1], [], []>} : vector<16x32xf32>, vector<32x8xf32>, vector<16x8xf32> -> vector<16x8xf32>
    %c0_6 = arith.constant 0 : index
    %c0_7 = arith.constant 0 : index
    %c0_8 = arith.constant 0 : index
    %6 = vector.load %arg5[%c0_6, %c0_7, %c0_8] : memref<4x1x8xf32, #tpu.memory_space<vmem>>, vector<1x1x8xf32>
    %7 = vector.shape_cast %6 : vector<1x1x8xf32> to vector<1x8xf32>
    %8 = vector.broadcast %7 : vector<1x8xf32> to vector<16x8xf32>
    %9 = arith.addf %5, %8 : vector<16x8xf32>
    %c0_9 = arith.constant 0 : index
    %c0_10 = arith.constant 0 : index
    %c0_11 = arith.constant 0 : index
    %10 = vector.load %arg3[%c0_9, %c0_10, %c0_11] : memref<4x32x8xf32, #tpu.memory_space<vmem>>, vector<1x32x8xf32>
    %11 = vector.shape_cast %10 : vector<1x32x8xf32> to vector<32x8xf32>
    %cst_12 = arith.constant dense<0.000000e+00> : vector<16x8xf32>
    %12 = tpu.matmul %0, %11, %cst_12 {dimension_numbers = #tpu.dot_dimension_numbers<[1], [0], [0], [1], [0, 0, 1, 1], [], []>} : vector<16x32xf32>, vector<32x8xf32>, vector<16x8xf32> -> vector<16x8xf32>
    %c0_13 = arith.constant 0 : index
    %c0_14 = arith.constant 0 : index
    %c0_15 = arith.constant 0 : index
    %13 = vector.load %arg6[%c0_13, %c0_14, %c0_15] : memref<4x1x8xf32, #tpu.memory_space<vmem>>, vector<1x1x8xf32>
    %14 = vector.shape_cast %13 : vector<1x1x8xf32> to vector<1x8xf32>
    %15 = vector.broadcast %14 : vector<1x8xf32> to vector<16x8xf32>
    %16 = arith.addf %12, %15 : vector<16x8xf32>
    %c0_16 = arith.constant 0 : index
    %c0_17 = arith.constant 0 : index
    %c0_18 = arith.constant 0 : index
    %17 = vector.load %arg4[%c0_16, %c0_17, %c0_18] : memref<4x32x8xf32, #tpu.memory_space<vmem>>, vector<1x32x8xf32>
    %18 = vector.shape_cast %17 : vector<1x32x8xf32> to vector<32x8xf32>
    %cst_19 = arith.constant dense<0.000000e+00> : vector<16x8xf32>
    %19 = tpu.matmul %0, %18, %cst_19 {dimension_numbers = #tpu.dot_dimension_numbers<[1], [0], [0], [1], [0, 0, 1, 1], [], []>} : vector<16x32xf32>, vector<32x8xf32>, vector<16x8xf32> -> vector<16x8xf32>
    %c0_20 = arith.constant 0 : index
    %c0_21 = arith.constant 0 : index
    %c0_22 = arith.constant 0 : index
    %20 = vector.load %arg7[%c0_20, %c0_21, %c0_22] : memref<4x1x8xf32, #tpu.memory_space<vmem>>, vector<1x1x8xf32>
    %21 = vector.shape_cast %20 : vector<1x1x8xf32> to vector<1x8xf32>
    %22 = vector.broadcast %21 : vector<1x8xf32> to vector<16x8xf32>
    %23 = arith.addf %19, %22 : vector<16x8xf32>
    %24 = vector.extract_strided_slice %9 {offsets = [0, 0], sizes = [8, 8], strides = [1, 1]} : vector<16x8xf32> to vector<8x8xf32>
    %25 = vector.extract_strided_slice %16 {offsets = [0, 0], sizes = [8, 8], strides = [1, 1]} : vector<16x8xf32> to vector<8x8xf32>
    %26 = vector.extract_strided_slice %23 {offsets = [0, 0], sizes = [8, 8], strides = [1, 1]} : vector<16x8xf32> to vector<8x8xf32>
    %cst_23 = arith.constant dense<0.000000e+00> : vector<8x8xf32>
    %27 = tpu.matmul %24, %25, %cst_23 {dimension_numbers = #tpu.dot_dimension_numbers<[1], [1], [0], [0], [0, 0, 1, 0], [], []>} : vector<8x8xf32>, vector<8x8xf32>, vector<8x8xf32> -> vector<8x8xf32>
    %c0_24 = arith.constant 0 : index
    %c0_25 = arith.constant 0 : index
    %c0_26 = arith.constant 0 : index
    %28 = vector.load %arg1[%c0_24, %c0_25, %c0_26] : memref<2x1x8xf32, #tpu.memory_space<vmem>>, vector<1x1x8xf32>
    %29 = vector.shape_cast %28 : vector<1x1x8xf32> to vector<1x8xf32>
    %30 = vector.broadcast %29 : vector<1x8xf32> to vector<8x8xf32>
    %31 = arith.addf %27, %30 : vector<8x8xf32>
    %cst_27 = arith.constant dense<0xFF800000> : vector<8xf32>
    %32 = vector.multi_reduction <maximumf>, %31, %cst_27 [1] : vector<8x8xf32> to vector<8xf32>
    %33 = vector.shape_cast %32 : vector<8xf32> to vector<8x1xf32>
    %34 = vector.broadcast %33 : vector<8x1xf32> to vector<8x8xf32>
    %35 = arith.subf %31, %34 : vector<8x8xf32>
    %36 = math.exp %35 : vector<8x8xf32>
    %cst_28 = arith.constant dense<0.000000e+00> : vector<8xf32>
    %37 = vector.multi_reduction <add>, %36, %cst_28 [1] : vector<8x8xf32> to vector<8xf32>
    %38 = vector.shape_cast %37 : vector<8xf32> to vector<8x1xf32>
    %39 = tpu.reciprocal %38 {approx = true} : vector<8x1xf32> -> vector<8x1xf32>
    %40 = vector.broadcast %39 : vector<8x1xf32> to vector<8x8xf32>
    %41 = arith.mulf %36, %40 : vector<8x8xf32>
    %cst_29 = arith.constant dense<0.000000e+00> : vector<8x8xf32>
    %42 = tpu.matmul %41, %26, %cst_29 {dimension_numbers = #tpu.dot_dimension_numbers<[1], [0], [0], [1], [0, 0, 1, 1], [], []>} : vector<8x8xf32>, vector<8x8xf32>, vector<8x8xf32> -> vector<8x8xf32>
    %43 = vector.extract_strided_slice %9 {offsets = [8, 0], sizes = [8, 8], strides = [1, 1]} : vector<16x8xf32> to vector<8x8xf32>
    %44 = vector.extract_strided_slice %16 {offsets = [8, 0], sizes = [8, 8], strides = [1, 1]} : vector<16x8xf32> to vector<8x8xf32>
    %45 = vector.extract_strided_slice %23 {offsets = [8, 0], sizes = [8, 8], strides = [1, 1]} : vector<16x8xf32> to vector<8x8xf32>
    %cst_30 = arith.constant dense<0.000000e+00> : vector<8x8xf32>
    %46 = tpu.matmul %43, %44, %cst_30 {dimension_numbers = #tpu.dot_dimension_numbers<[1], [1], [0], [0], [0, 0, 1, 0], [], []>} : vector<8x8xf32>, vector<8x8xf32>, vector<8x8xf32> -> vector<8x8xf32>
    %c1 = arith.constant 1 : index
    %c0_31 = arith.constant 0 : index
    %c0_32 = arith.constant 0 : index
    %47 = vector.load %arg1[%c1, %c0_31, %c0_32] : memref<2x1x8xf32, #tpu.memory_space<vmem>>, vector<1x1x8xf32>
    %48 = vector.shape_cast %47 : vector<1x1x8xf32> to vector<1x8xf32>
    %49 = vector.broadcast %48 : vector<1x8xf32> to vector<8x8xf32>
    %50 = arith.addf %46, %49 : vector<8x8xf32>
    %cst_33 = arith.constant dense<0xFF800000> : vector<8xf32>
    %51 = vector.multi_reduction <maximumf>, %50, %cst_33 [1] : vector<8x8xf32> to vector<8xf32>
    %52 = vector.shape_cast %51 : vector<8xf32> to vector<8x1xf32>
    %53 = vector.broadcast %52 : vector<8x1xf32> to vector<8x8xf32>
    %54 = arith.subf %50, %53 : vector<8x8xf32>
    %55 = math.exp %54 : vector<8x8xf32>
    %cst_34 = arith.constant dense<0.000000e+00> : vector<8xf32>
    %56 = vector.multi_reduction <add>, %55, %cst_34 [1] : vector<8x8xf32> to vector<8xf32>
    %57 = vector.shape_cast %56 : vector<8xf32> to vector<8x1xf32>
    %58 = tpu.reciprocal %57 {approx = true} : vector<8x1xf32> -> vector<8x1xf32>
    %59 = vector.broadcast %58 : vector<8x1xf32> to vector<8x8xf32>
    %60 = arith.mulf %55, %59 : vector<8x8xf32>
    %cst_35 = arith.constant dense<0.000000e+00> : vector<8x8xf32>
    %61 = tpu.matmul %60, %45, %cst_35 {dimension_numbers = #tpu.dot_dimension_numbers<[1], [0], [0], [1], [0, 0, 1, 1], [], []>} : vector<8x8xf32>, vector<8x8xf32>, vector<8x8xf32> -> vector<8x8xf32>
    %62 = tpu.concatenate %42, %61 in 0 : vector<8x8xf32>, vector<8x8xf32> -> vector<16x8xf32>
    %c0_36 = arith.constant 0 : index
    %c0_37 = arith.constant 0 : index
    %c0_38 = arith.constant 0 : index
    %63 = vector.load %arg8[%c0_36, %c0_37, %c0_38] : memref<4x8x32xf32, #tpu.memory_space<vmem>>, vector<1x8x32xf32>
    %64 = vector.shape_cast %63 : vector<1x8x32xf32> to vector<8x32xf32>
    %cst_39 = arith.constant dense<0.000000e+00> : vector<16x32xf32>
    %65 = tpu.matmul %62, %64, %cst_39 {dimension_numbers = #tpu.dot_dimension_numbers<[1], [0], [0], [1], [0, 0, 1, 1], [], []>} : vector<16x8xf32>, vector<8x32xf32>, vector<16x32xf32> -> vector<16x32xf32>
    %66 = arith.addf %1, %65 : vector<16x32xf32>
    %67 = tpu.concatenate %41, %60 in 0 : vector<8x8xf32>, vector<8x8xf32> -> vector<16x8xf32>
    %68 = arith.addf %2, %67 : vector<16x8xf32>
    %c1_40 = arith.constant 1 : index
    %c0_41 = arith.constant 0 : index
    %c0_42 = arith.constant 0 : index
    %69 = vector.load %arg2[%c1_40, %c0_41, %c0_42] : memref<4x32x8xf32, #tpu.memory_space<vmem>>, vector<1x32x8xf32>
    %70 = vector.shape_cast %69 : vector<1x32x8xf32> to vector<32x8xf32>
    %cst_43 = arith.constant dense<0.000000e+00> : vector<16x8xf32>
    %71 = tpu.matmul %0, %70, %cst_43 {dimension_numbers = #tpu.dot_dimension_numbers<[1], [0], [0], [1], [0, 0, 1, 1], [], []>} : vector<16x32xf32>, vector<32x8xf32>, vector<16x8xf32> -> vector<16x8xf32>
    %c1_44 = arith.constant 1 : index
    %c0_45 = arith.constant 0 : index
    %c0_46 = arith.constant 0 : index
    %72 = vector.load %arg5[%c1_44, %c0_45, %c0_46] : memref<4x1x8xf32, #tpu.memory_space<vmem>>, vector<1x1x8xf32>
    %73 = vector.shape_cast %72 : vector<1x1x8xf32> to vector<1x8xf32>
    %74 = vector.broadcast %73 : vector<1x8xf32> to vector<16x8xf32>
    %75 = arith.addf %71, %74 : vector<16x8xf32>
    %c1_47 = arith.constant 1 : index
    %c0_48 = arith.constant 0 : index
    %c0_49 = arith.constant 0 : index
    %76 = vector.load %arg3[%c1_47, %c0_48, %c0_49] : memref<4x32x8xf32, #tpu.memory_space<vmem>>, vector<1x32x8xf32>
    %77 = vector.shape_cast %76 : vector<1x32x8xf32> to vector<32x8xf32>
    %cst_50 = arith.constant dense<0.000000e+00> : vector<16x8xf32>
    %78 = tpu.matmul %0, %77, %cst_50 {dimension_numbers = #tpu.dot_dimension_numbers<[1], [0], [0], [1], [0, 0, 1, 1], [], []>} : vector<16x32xf32>, vector<32x8xf32>, vector<16x8xf32> -> vector<16x8xf32>
    %c1_51 = arith.constant 1 : index
    %c0_52 = arith.constant 0 : index
    %c0_53 = arith.constant 0 : index
    %79 = vector.load %arg6[%c1_51, %c0_52, %c0_53] : memref<4x1x8xf32, #tpu.memory_space<vmem>>, vector<1x1x8xf32>
    %80 = vector.shape_cast %79 : vector<1x1x8xf32> to vector<1x8xf32>
    %81 = vector.broadcast %80 : vector<1x8xf32> to vector<16x8xf32>
    %82 = arith.addf %78, %81 : vector<16x8xf32>
    %c1_54 = arith.constant 1 : index
    %c0_55 = arith.constant 0 : index
    %c0_56 = arith.constant 0 : index
    %83 = vector.load %arg4[%c1_54, %c0_55, %c0_56] : memref<4x32x8xf32, #tpu.memory_space<vmem>>, vector<1x32x8xf32>
    %84 = vector.shape_cast %83 : vector<1x32x8xf32> to vector<32x8xf32>
    %cst_57 = arith.constant dense<0.000000e+00> : vector<16x8xf32>
    %85 = tpu.matmul %0, %84, %cst_57 {dimension_numbers = #tpu.dot_dimension_numbers<[1], [0], [0], [1], [0, 0, 1, 1], [], []>} : vector<16x32xf32>, vector<32x8xf32>, vector<16x8xf32> -> vector<16x8xf32>
    %c1_58 = arith.constant 1 : index
    %c0_59 = arith.constant 0 : index
    %c0_60 = arith.constant 0 : index
    %86 = vector.load %arg7[%c1_58, %c0_59, %c0_60] : memref<4x1x8xf32, #tpu.memory_space<vmem>>, vector<1x1x8xf32>
    %87 = vector.shape_cast %86 : vector<1x1x8xf32> to vector<1x8xf32>
    %88 = vector.broadcast %87 : vector<1x8xf32> to vector<16x8xf32>
    %89 = arith.addf %85, %88 : vector<16x8xf32>
    %90 = vector.extract_strided_slice %75 {offsets = [0, 0], sizes = [8, 8], strides = [1, 1]} : vector<16x8xf32> to vector<8x8xf32>
    %91 = vector.extract_strided_slice %82 {offsets = [0, 0], sizes = [8, 8], strides = [1, 1]} : vector<16x8xf32> to vector<8x8xf32>
    %92 = vector.extract_strided_slice %89 {offsets = [0, 0], sizes = [8, 8], strides = [1, 1]} : vector<16x8xf32> to vector<8x8xf32>
    %cst_61 = arith.constant dense<0.000000e+00> : vector<8x8xf32>
    %93 = tpu.matmul %90, %91, %cst_61 {dimension_numbers = #tpu.dot_dimension_numbers<[1], [1], [0], [0], [0, 0, 1, 0], [], []>} : vector<8x8xf32>, vector<8x8xf32>, vector<8x8xf32> -> vector<8x8xf32>
    %c0_62 = arith.constant 0 : index
    %c0_63 = arith.constant 0 : index
    %c0_64 = arith.constant 0 : index
    %94 = vector.load %arg1[%c0_62, %c0_63, %c0_64] : memref<2x1x8xf32, #tpu.memory_space<vmem>>, vector<1x1x8xf32>
    %95 = vector.shape_cast %94 : vector<1x1x8xf32> to vector<1x8xf32>
    %96 = vector.broadcast %95 : vector<1x8xf32> to vector<8x8xf32>
    %97 = arith.addf %93, %96 : vector<8x8xf32>
    %cst_65 = arith.constant dense<0xFF800000> : vector<8xf32>
    %98 = vector.multi_reduction <maximumf>, %97, %cst_65 [1] : vector<8x8xf32> to vector<8xf32>
    %99 = vector.shape_cast %98 : vector<8xf32> to vector<8x1xf32>
    %100 = vector.broadcast %99 : vector<8x1xf32> to vector<8x8xf32>
    %101 = arith.subf %97, %100 : vector<8x8xf32>
    %102 = math.exp %101 : vector<8x8xf32>
    %cst_66 = arith.constant dense<0.000000e+00> : vector<8xf32>
    %103 = vector.multi_reduction <add>, %102, %cst_66 [1] : vector<8x8xf32> to vector<8xf32>
    %104 = vector.shape_cast %103 : vector<8xf32> to vector<8x1xf32>
    %105 = tpu.reciprocal %104 {approx = true} : vector<8x1xf32> -> vector<8x1xf32>
    %106 = vector.broadcast %105 : vector<8x1xf32> to vector<8x8xf32>
    %107 = arith.mulf %102, %106 : vector<8x8xf32>
    %cst_67 = arith.constant dense<0.000000e+00> : vector<8x8xf32>
    %108 = tpu.matmul %107, %92, %cst_67 {dimension_numbers = #tpu.dot_dimension_numbers<[1], [0], [0], [1], [0, 0, 1, 1], [], []>} : vector<8x8xf32>, vector<8x8xf32>, vector<8x8xf32> -> vector<8x8xf32>
    %109 = vector.extract_strided_slice %75 {offsets = [8, 0], sizes = [8, 8], strides = [1, 1]} : vector<16x8xf32> to vector<8x8xf32>
    %110 = vector.extract_strided_slice %82 {offsets = [8, 0], sizes = [8, 8], strides = [1, 1]} : vector<16x8xf32> to vector<8x8xf32>
    %111 = vector.extract_strided_slice %89 {offsets = [8, 0], sizes = [8, 8], strides = [1, 1]} : vector<16x8xf32> to vector<8x8xf32>
    %cst_68 = arith.constant dense<0.000000e+00> : vector<8x8xf32>
    %112 = tpu.matmul %109, %110, %cst_68 {dimension_numbers = #tpu.dot_dimension_numbers<[1], [1], [0], [0], [0, 0, 1, 0], [], []>} : vector<8x8xf32>, vector<8x8xf32>, vector<8x8xf32> -> vector<8x8xf32>
    %c1_69 = arith.constant 1 : index
    %c0_70 = arith.constant 0 : index
    %c0_71 = arith.constant 0 : index
    %113 = vector.load %arg1[%c1_69, %c0_70, %c0_71] : memref<2x1x8xf32, #tpu.memory_space<vmem>>, vector<1x1x8xf32>
    %114 = vector.shape_cast %113 : vector<1x1x8xf32> to vector<1x8xf32>
    %115 = vector.broadcast %114 : vector<1x8xf32> to vector<8x8xf32>
    %116 = arith.addf %112, %115 : vector<8x8xf32>
    %cst_72 = arith.constant dense<0xFF800000> : vector<8xf32>
    %117 = vector.multi_reduction <maximumf>, %116, %cst_72 [1] : vector<8x8xf32> to vector<8xf32>
    %118 = vector.shape_cast %117 : vector<8xf32> to vector<8x1xf32>
    %119 = vector.broadcast %118 : vector<8x1xf32> to vector<8x8xf32>
    %120 = arith.subf %116, %119 : vector<8x8xf32>
    %121 = math.exp %120 : vector<8x8xf32>
    %cst_73 = arith.constant dense<0.000000e+00> : vector<8xf32>
    %122 = vector.multi_reduction <add>, %121, %cst_73 [1] : vector<8x8xf32> to vector<8xf32>
    %123 = vector.shape_cast %122 : vector<8xf32> to vector<8x1xf32>
    %124 = tpu.reciprocal %123 {approx = true} : vector<8x1xf32> -> vector<8x1xf32>
    %125 = vector.broadcast %124 : vector<8x1xf32> to vector<8x8xf32>
    %126 = arith.mulf %121, %125 : vector<8x8xf32>
    %cst_74 = arith.constant dense<0.000000e+00> : vector<8x8xf32>
    %127 = tpu.matmul %126, %111, %cst_74 {dimension_numbers = #tpu.dot_dimension_numbers<[1], [0], [0], [1], [0, 0, 1, 1], [], []>} : vector<8x8xf32>, vector<8x8xf32>, vector<8x8xf32> -> vector<8x8xf32>
    %128 = tpu.concatenate %108, %127 in 0 : vector<8x8xf32>, vector<8x8xf32> -> vector<16x8xf32>
    %c1_75 = arith.constant 1 : index
    %c0_76 = arith.constant 0 : index
    %c0_77 = arith.constant 0 : index
    %129 = vector.load %arg8[%c1_75, %c0_76, %c0_77] : memref<4x8x32xf32, #tpu.memory_space<vmem>>, vector<1x8x32xf32>
    %130 = vector.shape_cast %129 : vector<1x8x32xf32> to vector<8x32xf32>
    %cst_78 = arith.constant dense<0.000000e+00> : vector<16x32xf32>
    %131 = tpu.matmul %128, %130, %cst_78 {dimension_numbers = #tpu.dot_dimension_numbers<[1], [0], [0], [1], [0, 0, 1, 1], [], []>} : vector<16x8xf32>, vector<8x32xf32>, vector<16x32xf32> -> vector<16x32xf32>
    %132 = arith.addf %66, %131 : vector<16x32xf32>
    %133 = tpu.concatenate %107, %126 in 0 : vector<8x8xf32>, vector<8x8xf32> -> vector<16x8xf32>
    %134 = arith.addf %68, %133 : vector<16x8xf32>
    %c2 = arith.constant 2 : index
    %c0_79 = arith.constant 0 : index
    %c0_80 = arith.constant 0 : index
    %135 = vector.load %arg2[%c2, %c0_79, %c0_80] : memref<4x32x8xf32, #tpu.memory_space<vmem>>, vector<1x32x8xf32>
    %136 = vector.shape_cast %135 : vector<1x32x8xf32> to vector<32x8xf32>
    %cst_81 = arith.constant dense<0.000000e+00> : vector<16x8xf32>
    %137 = tpu.matmul %0, %136, %cst_81 {dimension_numbers = #tpu.dot_dimension_numbers<[1], [0], [0], [1], [0, 0, 1, 1], [], []>} : vector<16x32xf32>, vector<32x8xf32>, vector<16x8xf32> -> vector<16x8xf32>
    %c2_82 = arith.constant 2 : index
    %c0_83 = arith.constant 0 : index
    %c0_84 = arith.constant 0 : index
    %138 = vector.load %arg5[%c2_82, %c0_83, %c0_84] : memref<4x1x8xf32, #tpu.memory_space<vmem>>, vector<1x1x8xf32>
    %139 = vector.shape_cast %138 : vector<1x1x8xf32> to vector<1x8xf32>
    %140 = vector.broadcast %139 : vector<1x8xf32> to vector<16x8xf32>
    %141 = arith.addf %137, %140 : vector<16x8xf32>
    %c2_85 = arith.constant 2 : index
    %c0_86 = arith.constant 0 : index
    %c0_87 = arith.constant 0 : index
    %142 = vector.load %arg3[%c2_85, %c0_86, %c0_87] : memref<4x32x8xf32, #tpu.memory_space<vmem>>, vector<1x32x8xf32>
    %143 = vector.shape_cast %142 : vector<1x32x8xf32> to vector<32x8xf32>
    %cst_88 = arith.constant dense<0.000000e+00> : vector<16x8xf32>
    %144 = tpu.matmul %0, %143, %cst_88 {dimension_numbers = #tpu.dot_dimension_numbers<[1], [0], [0], [1], [0, 0, 1, 1], [], []>} : vector<16x32xf32>, vector<32x8xf32>, vector<16x8xf32> -> vector<16x8xf32>
    %c2_89 = arith.constant 2 : index
    %c0_90 = arith.constant 0 : index
    %c0_91 = arith.constant 0 : index
    %145 = vector.load %arg6[%c2_89, %c0_90, %c0_91] : memref<4x1x8xf32, #tpu.memory_space<vmem>>, vector<1x1x8xf32>
    %146 = vector.shape_cast %145 : vector<1x1x8xf32> to vector<1x8xf32>
    %147 = vector.broadcast %146 : vector<1x8xf32> to vector<16x8xf32>
    %148 = arith.addf %144, %147 : vector<16x8xf32>
    %c2_92 = arith.constant 2 : index
    %c0_93 = arith.constant 0 : index
    %c0_94 = arith.constant 0 : index
    %149 = vector.load %arg4[%c2_92, %c0_93, %c0_94] : memref<4x32x8xf32, #tpu.memory_space<vmem>>, vector<1x32x8xf32>
    %150 = vector.shape_cast %149 : vector<1x32x8xf32> to vector<32x8xf32>
    %cst_95 = arith.constant dense<0.000000e+00> : vector<16x8xf32>
    %151 = tpu.matmul %0, %150, %cst_95 {dimension_numbers = #tpu.dot_dimension_numbers<[1], [0], [0], [1], [0, 0, 1, 1], [], []>} : vector<16x32xf32>, vector<32x8xf32>, vector<16x8xf32> -> vector<16x8xf32>
    %c2_96 = arith.constant 2 : index
    %c0_97 = arith.constant 0 : index
    %c0_98 = arith.constant 0 : index
    %152 = vector.load %arg7[%c2_96, %c0_97, %c0_98] : memref<4x1x8xf32, #tpu.memory_space<vmem>>, vector<1x1x8xf32>
    %153 = vector.shape_cast %152 : vector<1x1x8xf32> to vector<1x8xf32>
    %154 = vector.broadcast %153 : vector<1x8xf32> to vector<16x8xf32>
    %155 = arith.addf %151, %154 : vector<16x8xf32>
    %156 = vector.extract_strided_slice %141 {offsets = [0, 0], sizes = [8, 8], strides = [1, 1]} : vector<16x8xf32> to vector<8x8xf32>
    %157 = vector.extract_strided_slice %148 {offsets = [0, 0], sizes = [8, 8], strides = [1, 1]} : vector<16x8xf32> to vector<8x8xf32>
    %158 = vector.extract_strided_slice %155 {offsets = [0, 0], sizes = [8, 8], strides = [1, 1]} : vector<16x8xf32> to vector<8x8xf32>
    %cst_99 = arith.constant dense<0.000000e+00> : vector<8x8xf32>
    %159 = tpu.matmul %156, %157, %cst_99 {dimension_numbers = #tpu.dot_dimension_numbers<[1], [1], [0], [0], [0, 0, 1, 0], [], []>} : vector<8x8xf32>, vector<8x8xf32>, vector<8x8xf32> -> vector<8x8xf32>
    %c0_100 = arith.constant 0 : index
    %c0_101 = arith.constant 0 : index
    %c0_102 = arith.constant 0 : index
    %160 = vector.load %arg1[%c0_100, %c0_101, %c0_102] : memref<2x1x8xf32, #tpu.memory_space<vmem>>, vector<1x1x8xf32>
    %161 = vector.shape_cast %160 : vector<1x1x8xf32> to vector<1x8xf32>
    %162 = vector.broadcast %161 : vector<1x8xf32> to vector<8x8xf32>
    %163 = arith.addf %159, %162 : vector<8x8xf32>
    %cst_103 = arith.constant dense<0xFF800000> : vector<8xf32>
    %164 = vector.multi_reduction <maximumf>, %163, %cst_103 [1] : vector<8x8xf32> to vector<8xf32>
    %165 = vector.shape_cast %164 : vector<8xf32> to vector<8x1xf32>
    %166 = vector.broadcast %165 : vector<8x1xf32> to vector<8x8xf32>
    %167 = arith.subf %163, %166 : vector<8x8xf32>
    %168 = math.exp %167 : vector<8x8xf32>
    %cst_104 = arith.constant dense<0.000000e+00> : vector<8xf32>
    %169 = vector.multi_reduction <add>, %168, %cst_104 [1] : vector<8x8xf32> to vector<8xf32>
    %170 = vector.shape_cast %169 : vector<8xf32> to vector<8x1xf32>
    %171 = tpu.reciprocal %170 {approx = true} : vector<8x1xf32> -> vector<8x1xf32>
    %172 = vector.broadcast %171 : vector<8x1xf32> to vector<8x8xf32>
    %173 = arith.mulf %168, %172 : vector<8x8xf32>
    %cst_105 = arith.constant dense<0.000000e+00> : vector<8x8xf32>
    %174 = tpu.matmul %173, %158, %cst_105 {dimension_numbers = #tpu.dot_dimension_numbers<[1], [0], [0], [1], [0, 0, 1, 1], [], []>} : vector<8x8xf32>, vector<8x8xf32>, vector<8x8xf32> -> vector<8x8xf32>
    %175 = vector.extract_strided_slice %141 {offsets = [8, 0], sizes = [8, 8], strides = [1, 1]} : vector<16x8xf32> to vector<8x8xf32>
    %176 = vector.extract_strided_slice %148 {offsets = [8, 0], sizes = [8, 8], strides = [1, 1]} : vector<16x8xf32> to vector<8x8xf32>
    %177 = vector.extract_strided_slice %155 {offsets = [8, 0], sizes = [8, 8], strides = [1, 1]} : vector<16x8xf32> to vector<8x8xf32>
    %cst_106 = arith.constant dense<0.000000e+00> : vector<8x8xf32>
    %178 = tpu.matmul %175, %176, %cst_106 {dimension_numbers = #tpu.dot_dimension_numbers<[1], [1], [0], [0], [0, 0, 1, 0], [], []>} : vector<8x8xf32>, vector<8x8xf32>, vector<8x8xf32> -> vector<8x8xf32>
    %c1_107 = arith.constant 1 : index
    %c0_108 = arith.constant 0 : index
    %c0_109 = arith.constant 0 : index
    %179 = vector.load %arg1[%c1_107, %c0_108, %c0_109] : memref<2x1x8xf32, #tpu.memory_space<vmem>>, vector<1x1x8xf32>
    %180 = vector.shape_cast %179 : vector<1x1x8xf32> to vector<1x8xf32>
    %181 = vector.broadcast %180 : vector<1x8xf32> to vector<8x8xf32>
    %182 = arith.addf %178, %181 : vector<8x8xf32>
    %cst_110 = arith.constant dense<0xFF800000> : vector<8xf32>
    %183 = vector.multi_reduction <maximumf>, %182, %cst_110 [1] : vector<8x8xf32> to vector<8xf32>
    %184 = vector.shape_cast %183 : vector<8xf32> to vector<8x1xf32>
    %185 = vector.broadcast %184 : vector<8x1xf32> to vector<8x8xf32>
    %186 = arith.subf %182, %185 : vector<8x8xf32>
    %187 = math.exp %186 : vector<8x8xf32>
    %cst_111 = arith.constant dense<0.000000e+00> : vector<8xf32>
    %188 = vector.multi_reduction <add>, %187, %cst_111 [1] : vector<8x8xf32> to vector<8xf32>
    %189 = vector.shape_cast %188 : vector<8xf32> to vector<8x1xf32>
    %190 = tpu.reciprocal %189 {approx = true} : vector<8x1xf32> -> vector<8x1xf32>
    %191 = vector.broadcast %190 : vector<8x1xf32> to vector<8x8xf32>
    %192 = arith.mulf %187, %191 : vector<8x8xf32>
    %cst_112 = arith.constant dense<0.000000e+00> : vector<8x8xf32>
    %193 = tpu.matmul %192, %177, %cst_112 {dimension_numbers = #tpu.dot_dimension_numbers<[1], [0], [0], [1], [0, 0, 1, 1], [], []>} : vector<8x8xf32>, vector<8x8xf32>, vector<8x8xf32> -> vector<8x8xf32>
    %194 = tpu.concatenate %174, %193 in 0 : vector<8x8xf32>, vector<8x8xf32> -> vector<16x8xf32>
    %c2_113 = arith.constant 2 : index
    %c0_114 = arith.constant 0 : index
    %c0_115 = arith.constant 0 : index
    %195 = vector.load %arg8[%c2_113, %c0_114, %c0_115] : memref<4x8x32xf32, #tpu.memory_space<vmem>>, vector<1x8x32xf32>
    %196 = vector.shape_cast %195 : vector<1x8x32xf32> to vector<8x32xf32>
    %cst_116 = arith.constant dense<0.000000e+00> : vector<16x32xf32>
    %197 = tpu.matmul %194, %196, %cst_116 {dimension_numbers = #tpu.dot_dimension_numbers<[1], [0], [0], [1], [0, 0, 1, 1], [], []>} : vector<16x8xf32>, vector<8x32xf32>, vector<16x32xf32> -> vector<16x32xf32>
    %198 = arith.addf %132, %197 : vector<16x32xf32>
    %199 = tpu.concatenate %173, %192 in 0 : vector<8x8xf32>, vector<8x8xf32> -> vector<16x8xf32>
    %200 = arith.addf %134, %199 : vector<16x8xf32>
    %c3 = arith.constant 3 : index
    %c0_117 = arith.constant 0 : index
    %c0_118 = arith.constant 0 : index
    %201 = vector.load %arg2[%c3, %c0_117, %c0_118] : memref<4x32x8xf32, #tpu.memory_space<vmem>>, vector<1x32x8xf32>
    %202 = vector.shape_cast %201 : vector<1x32x8xf32> to vector<32x8xf32>
    %cst_119 = arith.constant dense<0.000000e+00> : vector<16x8xf32>
    %203 = tpu.matmul %0, %202, %cst_119 {dimension_numbers = #tpu.dot_dimension_numbers<[1], [0], [0], [1], [0, 0, 1, 1], [], []>} : vector<16x32xf32>, vector<32x8xf32>, vector<16x8xf32> -> vector<16x8xf32>
    %c3_120 = arith.constant 3 : index
    %c0_121 = arith.constant 0 : index
    %c0_122 = arith.constant 0 : index
    %204 = vector.load %arg5[%c3_120, %c0_121, %c0_122] : memref<4x1x8xf32, #tpu.memory_space<vmem>>, vector<1x1x8xf32>
    %205 = vector.shape_cast %204 : vector<1x1x8xf32> to vector<1x8xf32>
    %206 = vector.broadcast %205 : vector<1x8xf32> to vector<16x8xf32>
    %207 = arith.addf %203, %206 : vector<16x8xf32>
    %c3_123 = arith.constant 3 : index
    %c0_124 = arith.constant 0 : index
    %c0_125 = arith.constant 0 : index
    %208 = vector.load %arg3[%c3_123, %c0_124, %c0_125] : memref<4x32x8xf32, #tpu.memory_space<vmem>>, vector<1x32x8xf32>
    %209 = vector.shape_cast %208 : vector<1x32x8xf32> to vector<32x8xf32>
    %cst_126 = arith.constant dense<0.000000e+00> : vector<16x8xf32>
    %210 = tpu.matmul %0, %209, %cst_126 {dimension_numbers = #tpu.dot_dimension_numbers<[1], [0], [0], [1], [0, 0, 1, 1], [], []>} : vector<16x32xf32>, vector<32x8xf32>, vector<16x8xf32> -> vector<16x8xf32>
    %c3_127 = arith.constant 3 : index
    %c0_128 = arith.constant 0 : index
    %c0_129 = arith.constant 0 : index
    %211 = vector.load %arg6[%c3_127, %c0_128, %c0_129] : memref<4x1x8xf32, #tpu.memory_space<vmem>>, vector<1x1x8xf32>
    %212 = vector.shape_cast %211 : vector<1x1x8xf32> to vector<1x8xf32>
    %213 = vector.broadcast %212 : vector<1x8xf32> to vector<16x8xf32>
    %214 = arith.addf %210, %213 : vector<16x8xf32>
    %c3_130 = arith.constant 3 : index
    %c0_131 = arith.constant 0 : index
    %c0_132 = arith.constant 0 : index
    %215 = vector.load %arg4[%c3_130, %c0_131, %c0_132] : memref<4x32x8xf32, #tpu.memory_space<vmem>>, vector<1x32x8xf32>
    %216 = vector.shape_cast %215 : vector<1x32x8xf32> to vector<32x8xf32>
    %cst_133 = arith.constant dense<0.000000e+00> : vector<16x8xf32>
    %217 = tpu.matmul %0, %216, %cst_133 {dimension_numbers = #tpu.dot_dimension_numbers<[1], [0], [0], [1], [0, 0, 1, 1], [], []>} : vector<16x32xf32>, vector<32x8xf32>, vector<16x8xf32> -> vector<16x8xf32>
    %c3_134 = arith.constant 3 : index
    %c0_135 = arith.constant 0 : index
    %c0_136 = arith.constant 0 : index
    %218 = vector.load %arg7[%c3_134, %c0_135, %c0_136] : memref<4x1x8xf32, #tpu.memory_space<vmem>>, vector<1x1x8xf32>
    %219 = vector.shape_cast %218 : vector<1x1x8xf32> to vector<1x8xf32>
    %220 = vector.broadcast %219 : vector<1x8xf32> to vector<16x8xf32>
    %221 = arith.addf %217, %220 : vector<16x8xf32>
    %222 = vector.extract_strided_slice %207 {offsets = [0, 0], sizes = [8, 8], strides = [1, 1]} : vector<16x8xf32> to vector<8x8xf32>
    %223 = vector.extract_strided_slice %214 {offsets = [0, 0], sizes = [8, 8], strides = [1, 1]} : vector<16x8xf32> to vector<8x8xf32>
    %224 = vector.extract_strided_slice %221 {offsets = [0, 0], sizes = [8, 8], strides = [1, 1]} : vector<16x8xf32> to vector<8x8xf32>
    %cst_137 = arith.constant dense<0.000000e+00> : vector<8x8xf32>
    %225 = tpu.matmul %222, %223, %cst_137 {dimension_numbers = #tpu.dot_dimension_numbers<[1], [1], [0], [0], [0, 0, 1, 0], [], []>} : vector<8x8xf32>, vector<8x8xf32>, vector<8x8xf32> -> vector<8x8xf32>
    %c0_138 = arith.constant 0 : index
    %c0_139 = arith.constant 0 : index
    %c0_140 = arith.constant 0 : index
    %226 = vector.load %arg1[%c0_138, %c0_139, %c0_140] : memref<2x1x8xf32, #tpu.memory_space<vmem>>, vector<1x1x8xf32>
    %227 = vector.shape_cast %226 : vector<1x1x8xf32> to vector<1x8xf32>
    %228 = vector.broadcast %227 : vector<1x8xf32> to vector<8x8xf32>
    %229 = arith.addf %225, %228 : vector<8x8xf32>
    %cst_141 = arith.constant dense<0xFF800000> : vector<8xf32>
    %230 = vector.multi_reduction <maximumf>, %229, %cst_141 [1] : vector<8x8xf32> to vector<8xf32>
    %231 = vector.shape_cast %230 : vector<8xf32> to vector<8x1xf32>
    %232 = vector.broadcast %231 : vector<8x1xf32> to vector<8x8xf32>
    %233 = arith.subf %229, %232 : vector<8x8xf32>
    %234 = math.exp %233 : vector<8x8xf32>
    %cst_142 = arith.constant dense<0.000000e+00> : vector<8xf32>
    %235 = vector.multi_reduction <add>, %234, %cst_142 [1] : vector<8x8xf32> to vector<8xf32>
    %236 = vector.shape_cast %235 : vector<8xf32> to vector<8x1xf32>
    %237 = tpu.reciprocal %236 {approx = true} : vector<8x1xf32> -> vector<8x1xf32>
    %238 = vector.broadcast %237 : vector<8x1xf32> to vector<8x8xf32>
    %239 = arith.mulf %234, %238 : vector<8x8xf32>
    %cst_143 = arith.constant dense<0.000000e+00> : vector<8x8xf32>
    %240 = tpu.matmul %239, %224, %cst_143 {dimension_numbers = #tpu.dot_dimension_numbers<[1], [0], [0], [1], [0, 0, 1, 1], [], []>} : vector<8x8xf32>, vector<8x8xf32>, vector<8x8xf32> -> vector<8x8xf32>
    %241 = vector.extract_strided_slice %207 {offsets = [8, 0], sizes = [8, 8], strides = [1, 1]} : vector<16x8xf32> to vector<8x8xf32>
    %242 = vector.extract_strided_slice %214 {offsets = [8, 0], sizes = [8, 8], strides = [1, 1]} : vector<16x8xf32> to vector<8x8xf32>
    %243 = vector.extract_strided_slice %221 {offsets = [8, 0], sizes = [8, 8], strides = [1, 1]} : vector<16x8xf32> to vector<8x8xf32>
    %cst_144 = arith.constant dense<0.000000e+00> : vector<8x8xf32>
    %244 = tpu.matmul %241, %242, %cst_144 {dimension_numbers = #tpu.dot_dimension_numbers<[1], [1], [0], [0], [0, 0, 1, 0], [], []>} : vector<8x8xf32>, vector<8x8xf32>, vector<8x8xf32> -> vector<8x8xf32>
    %c1_145 = arith.constant 1 : index
    %c0_146 = arith.constant 0 : index
    %c0_147 = arith.constant 0 : index
    %245 = vector.load %arg1[%c1_145, %c0_146, %c0_147] : memref<2x1x8xf32, #tpu.memory_space<vmem>>, vector<1x1x8xf32>
    %246 = vector.shape_cast %245 : vector<1x1x8xf32> to vector<1x8xf32>
    %247 = vector.broadcast %246 : vector<1x8xf32> to vector<8x8xf32>
    %248 = arith.addf %244, %247 : vector<8x8xf32>
    %cst_148 = arith.constant dense<0xFF800000> : vector<8xf32>
    %249 = vector.multi_reduction <maximumf>, %248, %cst_148 [1] : vector<8x8xf32> to vector<8xf32>
    %250 = vector.shape_cast %249 : vector<8xf32> to vector<8x1xf32>
    %251 = vector.broadcast %250 : vector<8x1xf32> to vector<8x8xf32>
    %252 = arith.subf %248, %251 : vector<8x8xf32>
    %253 = math.exp %252 : vector<8x8xf32>
    %cst_149 = arith.constant dense<0.000000e+00> : vector<8xf32>
    %254 = vector.multi_reduction <add>, %253, %cst_149 [1] : vector<8x8xf32> to vector<8xf32>
    %255 = vector.shape_cast %254 : vector<8xf32> to vector<8x1xf32>
    %256 = tpu.reciprocal %255 {approx = true} : vector<8x1xf32> -> vector<8x1xf32>
    %257 = vector.broadcast %256 : vector<8x1xf32> to vector<8x8xf32>
    %258 = arith.mulf %253, %257 : vector<8x8xf32>
    %cst_150 = arith.constant dense<0.000000e+00> : vector<8x8xf32>
    %259 = tpu.matmul %258, %243, %cst_150 {dimension_numbers = #tpu.dot_dimension_numbers<[1], [0], [0], [1], [0, 0, 1, 1], [], []>} : vector<8x8xf32>, vector<8x8xf32>, vector<8x8xf32> -> vector<8x8xf32>
    %260 = tpu.concatenate %240, %259 in 0 : vector<8x8xf32>, vector<8x8xf32> -> vector<16x8xf32>
    %c3_151 = arith.constant 3 : index
    %c0_152 = arith.constant 0 : index
    %c0_153 = arith.constant 0 : index
    %261 = vector.load %arg8[%c3_151, %c0_152, %c0_153] : memref<4x8x32xf32, #tpu.memory_space<vmem>>, vector<1x8x32xf32>
    %262 = vector.shape_cast %261 : vector<1x8x32xf32> to vector<8x32xf32>
    %cst_154 = arith.constant dense<0.000000e+00> : vector<16x32xf32>
    %263 = tpu.matmul %260, %262, %cst_154 {dimension_numbers = #tpu.dot_dimension_numbers<[1], [0], [0], [1], [0, 0, 1, 1], [], []>} : vector<16x8xf32>, vector<8x32xf32>, vector<16x32xf32> -> vector<16x32xf32>
    %264 = arith.addf %198, %263 : vector<16x32xf32>
    %265 = tpu.concatenate %239, %258 in 0 : vector<8x8xf32>, vector<8x8xf32> -> vector<16x8xf32>
    %266 = arith.addf %200, %265 : vector<16x8xf32>
    %c0_155 = arith.constant 0 : index
    %c0_156 = arith.constant 0 : index
    %267 = vector.load %arg9[%c0_155, %c0_156] : memref<1x32xf32, #tpu.memory_space<vmem>>, vector<1x32xf32>
    %268 = vector.broadcast %267 : vector<1x32xf32> to vector<16x32xf32>
    %269 = arith.addf %264, %268 : vector<16x32xf32>
    %c0_157 = arith.constant 0 : index
    %c0_158 = arith.constant 0 : index
    %270 = vector.load %arg10[%c0_157, %c0_158] : memref<16x32xf32, #tpu.memory_space<vmem>>, vector<16x32xf32>
    tpu.vector_store %arg10[%c0_157, %c0_158], %269 {strides = array<i32>} : memref<16x32xf32, #tpu.memory_space<vmem>>, vector<16x32xf32>,
    %cst_159 = arith.constant 2.500000e-01 : f32
    %271 = vector.broadcast %cst_159 : f32 to vector<16x8xf32>
    %272 = arith.mulf %266, %271 : vector<16x8xf32>
    %c0_160 = arith.constant 0 : index
    %c0_161 = arith.constant 0 : index
    %273 = vector.load %arg11[%c0_160, %c0_161] : memref<16x8xf32, #tpu.memory_space<vmem>>, vector<16x8xf32>
    tpu.vector_store %arg11[%c0_160, %c0_161], %272 {strides = array<i32>} : memref<16x8xf32, #tpu.memory_space<vmem>>, vector<16x8xf32>,
    return
  }
}

</mosaic_0001>

<bundles_post_ra>
// kernel: tpu_custom_call.1
= control target key start
LH: loop header
LB: loop body
LE: loop exit
PB: predicated region body
PF: predicated region fallthrough
CT: control target
= control target key end

     0   :  { %vm51_vm0 = vcmask 261120   ;;  %s3884_s0 = inlined_call_operand.vmem [shape: f32[16,32], index: 0, kind: input, shape index: {}]   ;;  %s3885_s1 = inlined_call_operand.vmem [shape: f32[2,1,8], index: 1, kind: input, shape index: {}]   ;;  %s3886_s2 = inlined_call_operand.vmem [shape: f32[4,32,8], index: 2, kind: input, shape index: {}]   ;;  %s3887_s3 = inlined_call_operand.vmem [shape: f32[4,32,8], index: 3, kind: input, shape index: {}]   ;;  %s3888_s4 = inlined_call_operand.vmem [shape: f32[4,32,8], index: 4, kind: input, shape index: {}]   ;;  %s3889_s5 = inlined_call_operand.vmem [shape: f32[4,1,8], index: 5, kind: input, shape index: {}]   ;;  %s3890_s6 = inlined_call_operand.vmem [shape: f32[4,1,8], index: 6, kind: input, shape index: {}]   ;;  %s3891_s7 = inlined_call_operand.vmem [shape: f32[4,1,8], index: 7, kind: input, shape index: {}]   ;;  %s3892_s8 = inlined_call_operand.vmem [shape: f32[4,8,32], index: 8, kind: input, shape index: {}]   ;;  %s3893_s9 = inlined_call_operand.vmem [shape: f32[1,32], index: 9, kind: input, shape index: {}]   ;;  %s3894_s10 = inlined_call_operand.hbm [shape: f32[16,32], index: 10, kind: output, shape index: {0}]   ;;  %s3895_s11 = inlined_call_operand.vmem [shape: f32[16,8], index: 11, kind: output, shape index: {1}]  }
   0x1   :  { %v133_v0 = vld [vmem:[%s3887_s3] sm:$0xff]  ;;  %v134_v1 = vld [vmem:[%s3887_s3 + $0x8] sm:$0xff]  ;;  %v135_v5 = vld [vmem:[%s3887_s3 + $0x10] sm:$0xff] }
   0x2   :  { %v40_v2 = vld [vmem:[%s3886_s2] sm:$0xff]  ;;  %v3247_v3 = vpack.c.bf16 %v134_v1, %v133_v0  ;;  %v41_v4 = vld [vmem:[%s3886_s2 + $0x8] sm:$0xff]  ;;  %v136_v6 = vld [vmem:[%s3887_s3 + $0x18] sm:$0xff] }
   0x3   :  { %v3239_v7 = vpack.c.bf16 %v41_v4, %v40_v2  ;;  %v3251_v8 = vpack.c.bf16 %v136_v6, %v135_v5  ;;  %v42_v9 = vld [vmem:[%s3886_s2 + $0x10] sm:$0xff]  ;;  %v43_v10 = vld [vmem:[%s3886_s2 + $0x18] sm:$0xff]  ;;  %v3494_v11 = vld [vmem:[%s3884_s0] sm:$0xff] }
   0x4   :  { %3248 = vmatprep.subr.bf16.mxu1 %v3247_v3  ;;  %v3243_v12 = vpack.c.bf16 %v43_v10, %v42_v9  ;;  %3026 = vmatprep.mubr.msk.f32.mxu1 %vm51_vm0, %v3494_v11 }
   0x5   :  { %17 = vsyncpa [#allocation3], 0  ;;  %3250 = vmatpush3.bf16.msra.mxu1 %v3247_v3  ;;  %3240 = vmatprep.subr.bf16.mxu0 %v3239_v7  ;;  %v3503_v13 = vld [vmem:[%s3884_s0 + $0x8] sm:$0xff]  ;;  %v3402_v14 = vmov 0.0   ;;  %vm3403_vm1 = vmmov 0   ;;  %vm312_vm2 = vcmask 64512  }
   0x6   :  { %3242 = vmatpush3.bf16.msra.mxu0 %v3239_v7  ;;  %3252 = vmatprep.subr.bf16.mxu1 %v3251_v8  ;;  %v2774_v15 = vld [vmem:[%s3890_s6] ss:$0 sm:$0xff]  ;;  %v220_v26 = vld [vmem:[%s3888_s4 + $0x8] sm:$0xff]  ;;  %v221_v27 = vld [vmem:[%s3888_s4 + $0x10] sm:$0xff] }
   0x7   :  { %3244 = vmatprep.subr.bf16.mxu0 %v3243_v12  ;;  %3015 = vmatprep.mubr.msk.f32.mxu0 %vm51_vm0, %v3494_v11  ;;  %v2771_v16 = vld [vmem:[%s3889_s5] ss:$0 sm:$0xff]  ;;  %v222_v29 = vld [vmem:[%s3888_s4 + $0x18] sm:$0xff]  ;;  %v3569_v51 = vld [vmem:[%s3885_s1 + $0x1] ss:$0 sm:$0xff] }
   0x8   :  { %v219_v25 = vld [vmem:[%s3888_s4] sm:$0xff]  ;;  %v3259_v30 = vpack.c.bf16 %v222_v29, %v221_v27  ;;  %v2798_v62 = vld [vmem:[%s3887_s3 + $0x28] sm:$0xff]  ;;  %v2791_v3 = vld [vmem:[%s3886_s2 + $0x30] sm:$0xff] }
   0x9   :  { %3254 = vmatpush3.bf16.msra.mxu1 %v3251_v8  ;;  %v3255_v28 = vpack.c.bf16 %v220_v26, %v219_v25  ;;  %v3544_v31 = vld [vmem:[%s3885_s1] ss:$0 sm:$0xff]  ;;  %v2790_v1 = vld [vmem:[%s3886_s2 + $0x28] sm:$0xff]  ;;  %v2792_v4 = vld [vmem:[%s3886_s2 + $0x38] sm:$0xff] }
   0xa   :  { %3246 = vmatpush3.bf16.msra.mxu0 %v3243_v12  ;;  %3040 = vmatprep.subr.mxu1 %v3402_v14  ;;  %v2777_v42 = vld [vmem:[%s3891_s7] ss:$0 sm:$0xff]  ;;  %v3267_v5 = vpack.c.bf16 %v2792_v4, %v2791_v3  ;;  %v2806_v7 = vld [vmem:[%s3888_s4 + $0x28] sm:$0xff]  ;;  %v2799_v10 = vld [vmem:[%s3887_s3 + $0x30] sm:$0xff] }
   0xb   :  { %3256 = vmatprep.subr.bf16.mxu0 %v3255_v28  ;;  %v2797_v61 = vld [vmem:[%s3887_s3 + $0x20] sm:$0xff]  ;;  %v2800_v12 = vld [vmem:[%s3887_s3 + $0x38] sm:$0xff] }
   0xc   :  { %3027 = vmatmul.mubr.msk.f32.vlgmr.msra.gmra.mrb[0].mxu1 %vm51_vm0, %v3503_v13  ;;  %v3271_v63 = vpack.c.bf16 %v2798_v62, %v2797_v61  ;;  %v2789_v0 = vld [vmem:[%s3886_s2 + $0x20] sm:$0xff] }
   0xd   :  { %3016 = vmatmul.mubr.msk.f32.vlgmr.msra.gmra.mrb[0].mxu0 %vm51_vm0, %v3503_v13  ;;  %3042 = vmatprep.mubr.msk.f32.mxu1 %vm3403_vm1, %v3402_v14  ;;  %v3263_v2 = vpack.c.bf16 %v2790_v1, %v2789_v0  ;;  %v2805_v6 = vld [vmem:[%s3888_s4 + $0x20] sm:$0xff] }
   0xe   :  { %3037 = vmatprep.mubr.msk.f32.mxu0 %vm51_vm0, %v3494_v11  ;;  %3258 = vmatpush3.bf16.msra.mxu0 %v3255_v28  ;;  %v3279_v8 = vpack.c.bf16 %v2806_v7, %v2805_v6  ;;  %v2802_v25 = vld [vmem:[%s3890_s6 + $0x1] ss:$0 sm:$0xff]  ;;  %v2826_v7 = vld [vmem:[%s3886_s2 + $0x50] sm:$0xff] }
   0xf   :  { %3260 = vmatprep.subr.bf16.mxu0 %v3259_v30  ;;  %v2794_v26 = vld [vmem:[%s3889_s5 + $0x1] ss:$0 sm:$0xff] }
  0x10   :  { %v641_v3 = vld [vmem:[%s3892_s8] sm:$0xff] }
  0x11   :  { %v2824_v4 = vld [vmem:[%s3886_s2 + $0x40] sm:$0xff] }
  0x12   :  { %3262 = vmatpush3.bf16.msra.mxu0 %v3259_v30 }
  0x13   :  { %3264 = vmatprep.subr.bf16.mxu0 %v3263_v2 }
  0x15   :  { %3038 = vmatmul.mubr.msk.f32.vlgmr.msra.gmra.mrb[2].mxu0 %vm51_vm0, %v3503_v13 }
  0x16   :  { %3068 = vmatprep.mubr.msk.f32.mxu0 %vm51_vm0, %v3494_v11  ;;  %3266 = vmatpush3.bf16.msra.mxu0 %v3263_v2  ;;  %v2819_v2 = vld [vmem:[%s3892_s8 + $0x8] sm:$0xff] }
  0x17   :  { %3268 = vmatprep.subr.bf16.mxu0 %v3267_v5 }
  0x1a   :  { %3270 = vmatpush3.bf16.msra.mxu0 %v3267_v5  ;;  %v2825_v5 = vld [vmem:[%s3886_s2 + $0x48] sm:$0xff] }
  0x1b   :  { %3280 = vmatprep.subr.bf16.mxu0 %v3279_v8  ;;  %v3287_v6 = vpack.c.bf16 %v2825_v5, %v2824_v4 }
  0x1d   :  { %3069 = vmatmul.mubr.msk.f32.vlgmr.msra.gmra.mrb[4].mxu0 %vm51_vm0, %v3503_v13 }
  0x1e   :  { %3090 = vmatprep.mubr.msk.f32.mxu0 %vm51_vm0, %v3494_v11  ;;  %3282 = vmatpush3.bf16.msra.mxu0 %v3279_v8  ;;  %v2827_v8 = vld [vmem:[%s3886_s2 + $0x58] sm:$0xff] }
  0xdf   :  { %v3028_v17 = vpop.f32.mrb[0].mxu1 }
  0xe0   :  { %v216_v18 = vadd.f32 %v3028_v17, %v2774_v15  ;;  %v210_v19 = vpop.f32.mrb[1].mxu1  ;;  %v3017_v20 = vpop.f32.mrb[0].mxu0  ;;  %v3275_v17 = vpack.c.bf16 %v2800_v12, %v2799_v10  ;;  %v2832_v12 = vld [vmem:[%s3887_s3 + $0x40] sm:$0xff] }
  0xe1   :  { %v211_v21 = vadd.f32 %v2774_v15, %v210_v19  ;;  %v130_v22 = vadd.f32 %v3017_v20, %v2771_v16  ;;  %v124_v23 = vpop.f32.mrb[1].mxu0  ;;  %v2808_v19 = vld [vmem:[%s3888_s4 + $0x38] sm:$0xff] }
  0xe2   :  { %v125_v24 = vadd.f32 %v2771_v16, %v124_v23 }
  0xe3   :  { %3041 = vmatpush3.xpose.msk.msra.mxu1 %vm312_vm2, %v211_v21 }
  0xe4   :  { %3045 = vmatprep.subr.mxu1 %v3402_v14 }
  0xe6   :  { %3043 = vmatmul.mubr.msk.f32.vlgmr.msra.gmra.mrb[2].mxu1 %vm312_vm2, %v125_v24 }
  0xe7   :  { %3047 = vmatprep.mubr.msk.f32.mxu1 %vm3403_vm1, %v3402_v14 }
  0xe8   :  { %v3039_v41 = vpop.f32.mrb[2].mxu0 }
  0xe9   :  { %v296_v43 = vpop.f32.mrb[3].mxu0  ;;  %v302_v44 = vadd.f32 %v3039_v41, %v2777_v42 }
  0xea   :  { %v297_v45 = vadd.f32 %v2777_v42, %v296_v43 }
  0xec   :  { %3046 = vmatpush3.msra.mxu1 %v297_v45 }
  0xed   :  { %3050 = vmatprep.subr.mxu1 %v3402_v14 }
  0xf0   :  { %v3070_v21 = vpop.f32.mrb[4].mxu0 }
 0x1b9   :  { %v385_v32 = vpop.f32.mrb[2].mxu1 }
 0x1ba   :  { %v386_v33 = vadd.f32 %v3544_v31, %v385_v32  ;;  %v3044_v34 = vpop.f32.mrb[3].mxu1  ;;  %v729_v32 = vadd.f32 %v3070_v21, %v2794_v26  ;;  %v2834_v21 = vld [vmem:[%s3887_s3 + $0x50] sm:$0xff] }
 0x1bb   :  { %v2810_v34 = vld [vmem:[%s3891_s7 + $0x1] ss:$0 sm:$0xff] }
 0x1bc   :  { %v389_v35 = vsel %vm312_vm2, %v386_v33, -inf }
 0x1bd   :  { %390 = vmax.xlane.f32.xlu0 %v389_v35 }
 0x24a   :  { %v391_v36 = vpop.xlane.xlu0 %390 }
 0x24b   :  { %v392_v37 = vsub.f32 %v386_v33, %v391_v36 }
 0x24d   :  { %v393_v38 = vmul.f32 1.442695, %v392_v37 }
 0x24f   :  { %3346 = vpow2.f32 %v393_v38 }
 0x259   :  { %v3347_v39 = vpop.eup %3346 }
 0x25a   :  { %v395_v40 = vsel %vm312_vm2, %v3347_v39, 0.0 }
 0x25b   :  { %396 = vadd.xlane.f32.xlu0 %v395_v40 }
 0x2e8   :  { %v397_v46 = vpop.xlane.xlu0 %396 }
 0x2e9   :  { %3348 = vrcp.f32 %v397_v46 }
 0x2f3   :  { %v3349_v47 = vpop.eup %3348 }
 0x2f4   :  { %v3553_v48 = vmul.f32 %v3349_v47, %v3347_v39 }
 0x2f6   :  { %3048 = vmatmul.mubr.msk.f32.vlgmr.msra.gmra.mrb[4].mxu1 %vm312_vm2, %v3553_v48 }
 0x2f7   :  { %3051 = vmatpush3.xpose.msk.msra.mxu1 %vm312_vm2, %v216_v18  ;;  %3052 = vmatprep.mubr.msk.f32.mxu1 %vm3403_vm1, %v3402_v14  ;;  %v2807_v18 = vld [vmem:[%s3888_s4 + $0x30] sm:$0xff] }
 0x2f8   :  { %3055 = vmatprep.subr.mxu1 %v3402_v14  ;;  %v3283_v20 = vpack.c.bf16 %v2808_v19, %v2807_v18 }
 0x2fa   :  { %3053 = vmatmul.mubr.msk.f32.vlgmr.msra.gmra.mrb[6].mxu1 %vm312_vm2, %v130_v22  ;;  %3284 = vmatprep.subr.bf16.mxu0 %v3283_v20  ;;  %v723_v22 = vpop.f32.mrb[5].mxu0 }
 0x2fb   :  { %3056 = vmatpush3.msra.mxu1 %v302_v44  ;;  %3057 = vmatprep.mubr.msk.f32.mxu1 %vm3403_vm1, %v3402_v14  ;;  %v724_v33 = vadd.f32 %v2794_v26, %v723_v22  ;;  %v2835_v22 = vld [vmem:[%s3887_s3 + $0x58] sm:$0xff] }
 0x2fc   :  { %3272 = vmatprep.subr.bf16.mxu1 %v3271_v63  ;;  %3286 = vmatpush3.bf16.msra.mxu0 %v3283_v20 }
 0x2fd   :  { %3103 = vmatprep.subr.mxu0 %v3402_v14 }
 0x2ff   :  { %3091 = vmatmul.mubr.msk.f32.vlgmr.msra.gmra.mrb[6].mxu0 %vm51_vm0, %v3503_v13 }
 0x300   :  { %3105 = vmatprep.mubr.msk.f32.mxu0 %vm3403_vm1, %v3402_v14 }
 0x3c9   :  { %v3564_v49 = vpop.f32.mrb[4].mxu1 }
 0x3ca   :  { %v3049_v50 = vpop.f32.mrb[5].mxu1 }
 0x3cd   :  { %v553_v52 = vpop.f32.mrb[6].mxu1 }
 0x3ce   :  { %v554_v53 = vadd.f32 %v3569_v51, %v553_v52  ;;  %v3054_v54 = vpop.f32.mrb[7].mxu1 }
 0x3d0   :  { %v557_v55 = vsel %vm312_vm2, %v554_v53, -inf }
 0x3d1   :  { %558 = vmax.xlane.f32.xlu1 %v557_v55 }
 0x3d2   :  { %v3092_v35 = vpop.f32.mrb[6].mxu0 }
 0x3d3   :  { %v905_v36 = vadd.f32 %v3092_v35, %v2810_v34  ;;  %v899_v37 = vpop.f32.mrb[7].mxu0  ;;  %v2841_v35 = vld [vmem:[%s3888_s4 + $0x48] sm:$0xff] }
 0x3d4   :  { %v900_v38 = vadd.f32 %v2810_v34, %v899_v37  ;;  %v2840_v34 = vld [vmem:[%s3888_s4 + $0x40] sm:$0xff] }
 0x3d5   :  { %v3303_v37 = vpack.c.bf16 %v2841_v35, %v2840_v34 }
 0x45e   :  { %v559_v56 = vpop.xlane.xlu1 %558 }
 0x45f   :  { %v560_v57 = vsub.f32 %v554_v53, %v559_v56 }
 0x461   :  { %v561_v58 = vmul.f32 1.442695, %v560_v57 }
 0x463   :  { %3350 = vpow2.f32 %v561_v58 }
 0x46d   :  { %v3351_v59 = vpop.eup %3350 }
 0x46e   :  { %v563_v60 = vsel %vm312_vm2, %v3351_v59, 0.0 }
 0x46f   :  { %564 = vadd.xlane.f32.xlu1 %v563_v60 }
 0x4fc   :  { %v565_v9 = vpop.xlane.xlu1 %564 }
 0x4fd   :  { %3352 = vrcp.f32 %v565_v9  ;;  %v3291_v9 = vpack.c.bf16 %v2827_v8, %v2826_v7 }
 0x507   :  { %v3353_v15 = vpop.eup %3352 }
 0x508   :  { %v3608_v16 = vmul.f32 %v3353_v15, %v3351_v59  ;;  %v2833_v15 = vld [vmem:[%s3887_s3 + $0x48] sm:$0xff] }
 0x509   :  { %v3295_v18 = vpack.c.bf16 %v2833_v15, %v2832_v12 }
 0x50a   :  { %3058 = vmatmul.mubr.msk.f32.vlgmr.msra.gmra.mrb[8].mxu1 %vm312_vm2, %v3608_v16 }
 0x50b   :  { %3274 = vmatpush3.bf16.msra.mxu1 %v3271_v63  ;;  %3079 = vmatprep.mubr.msk.f32.mxu1 %vm51_vm0, %v3494_v11 }
 0x50c   :  { %3276 = vmatprep.subr.bf16.mxu1 %v3275_v17 }
 0x50f   :  { %3278 = vmatpush3.bf16.msra.mxu1 %v3275_v17 }
 0x510   :  { %3093 = vmatprep.subr.mxu1 %v3402_v14 }
 0x512   :  { %3080 = vmatmul.mubr.msk.f32.vlgmr.msra.gmra.mrb[10].mxu1 %vm51_vm0, %v3503_v13 }
 0x513   :  { %3095 = vmatprep.mubr.msk.f32.mxu1 %vm3403_vm1, %v3402_v14 }
 0x5dd   :  { %v3630_v23 = vpop.f32.mrb[8].mxu1 }
 0x5de   :  { %v3059_v24 = vpop.f32.mrb[9].mxu1 }
 0x5df   :  { %v3299_v24 = vpack.c.bf16 %v2835_v22, %v2834_v21  ;;  %v2859_v21 = vld [vmem:[%s3886_s2 + $0x70] sm:$0xff]  ;;  %v2860_v22 = vld [vmem:[%s3886_s2 + $0x78] sm:$0xff] }
 0x5e5   :  { %v3081_v27 = vpop.f32.mrb[10].mxu1 }
 0x5e6   :  { %v817_v28 = vadd.f32 %v3081_v27, %v2802_v25  ;;  %v811_v29 = vpop.f32.mrb[11].mxu1  ;;  %v2829_v27 = vld [vmem:[%s3889_s5 + $0x2] ss:$0 sm:$0xff] }
 0x5e7   :  { %v812_v30 = vadd.f32 %v2802_v25, %v811_v29 }
 0x5e8   :  { %3104 = vmatpush3.xpose.msk.msra.mxu0 %vm312_vm2, %v817_v28 }
 0x5e9   :  { %3094 = vmatpush3.xpose.msk.msra.mxu1 %vm312_vm2, %v812_v30  ;;  %3113 = vmatprep.subr.mxu0 %v2819_v2 }
 0x5ea   :  { %3098 = vmatprep.subr.mxu1 %v3402_v14 }
 0x5eb   :  { %3106 = vmatmul.mubr.msk.f32.vlgmr.msra.gmra.mrb[8].mxu0 %vm312_vm2, %v729_v32 }
 0x5ec   :  { %3096 = vmatmul.mubr.msk.f32.vlgmr.msra.gmra.mrb[12].mxu1 %vm312_vm2, %v724_v33  ;;  %3114 = vmatpush3.msra.mxu0 %v2819_v2 }
 0x5ed   :  { %3100 = vmatprep.mubr.msk.f32.mxu1 %vm3403_vm1, %v3402_v14  ;;  %3099 = vmatpush3.msra.mxu1 %v900_v38  ;;  %v2843_v38 = vld [vmem:[%s3888_s4 + $0x58] sm:$0xff] }
 0x5ee   :  { %3108 = vmatprep.subr.mxu1 %v3402_v14  ;;  %3118 = vmatprep.subr.mxu0 %v641_v3 }
 0x6be   :  { %v1140_v39 = vpop.f32.mrb[8].mxu0 }
 0x6bf   :  { %v1141_v40 = vadd.f32 %v3569_v51, %v1140_v39  ;;  %v980_v41 = vpop.f32.mrb[12].mxu1  ;;  %v3107_v42 = vpop.f32.mrb[9].mxu0 }
 0x6c0   :  { %v981_v43 = vadd.f32 %v3544_v31, %v980_v41  ;;  %v3097_v44 = vpop.f32.mrb[13].mxu1 }
 0x6c1   :  { %v1144_v45 = vsel %vm312_vm2, %v1141_v40, -inf }
 0x6c2   :  { %1145 = vmax.xlane.f32.xlu1 %v1144_v45  ;;  %v984_v46 = vsel %vm312_vm2, %v981_v43, -inf }
 0x6c3   :  { %985 = vmax.xlane.f32.xlu0 %v984_v46 }
 0x74f   :  { %v1146_v47 = vpop.xlane.xlu1 %1145 }
 0x750   :  { %v1147_v50 = vsub.f32 %v1141_v40, %v1146_v47  ;;  %v986_v52 = vpop.xlane.xlu0 %985 }
 0x751   :  { %v987_v53 = vsub.f32 %v981_v43, %v986_v52 }
 0x752   :  { %v1148_v54 = vmul.f32 1.442695, %v1147_v50 }
 0x753   :  { %v988_v55 = vmul.f32 1.442695, %v987_v53 }
 0x754   :  { %3354 = vpow2.f32 %v1148_v54 }
 0x755   :  { %3356 = vpow2.f32 %v988_v55 }
 0x75e   :  { %v3355_v56 = vpop.eup %3354 }
 0x75f   :  { %v3357_v57 = vpop.eup %3356  ;;  %v1150_v58 = vsel %vm312_vm2, %v3355_v56, 0.0 }
 0x760   :  { %1151 = vadd.xlane.f32.xlu1 %v1150_v58  ;;  %v990_v59 = vsel %vm312_vm2, %v3357_v57, 0.0 }
 0x761   :  { %991 = vadd.xlane.f32.xlu0 %v990_v59 }
 0x7ed   :  { %v1152_v60 = vpop.xlane.xlu1 %1151 }
 0x7ee   :  { %v992_v61 = vpop.xlane.xlu0 %991 }
 0x7ef   :  { %3358 = vrcp.f32 %v992_v61 }
 0x7f0   :  { %3360 = vrcp.f32 %v1152_v60 }
 0x7f9   :  { %v3359_v62 = vpop.eup %3358 }
 0x7fa   :  { %v3655_v63 = vmul.f32 %v3359_v62, %v3357_v57  ;;  %v3361_v0 = vpop.eup %3360  ;;  %v2845_v62 = vld [vmem:[%s3891_s7 + $0x2] ss:$0 sm:$0xff] }
 0x7fb   :  { %v3661_v1 = vmul.f32 %v3361_v0, %v3355_v56 }
 0x7fc   :  { %3101 = vmatmul.mubr.msk.f32.vlgmr.msra.gmra.mrb[14].mxu1 %vm312_vm2, %v3655_v63  ;;  %v1392_v7 = vadd.f32 %v3655_v63, %v3553_v48  ;;  %v2854_v48 = vld [vmem:[%s3892_s8 + $0x10] sm:$0xff]  ;;  %v2865_v63 = vld [vmem:[%s3887_s3 + $0x60] sm:$0xff] }
 0x7fd   :  { %3109 = vmatpush3.msra.mxu1 %v905_v36  ;;  %3110 = vmatprep.mubr.msk.f32.mxu1 %vm3403_vm1, %v3402_v14  ;;  %v2842_v36 = vld [vmem:[%s3888_s4 + $0x50] sm:$0xff]  ;;  %v1393_v12 = vadd.f32 %v3661_v1, %v3608_v16  ;;  %v2866_v16 = vld [vmem:[%s3887_s3 + $0x68] sm:$0xff] }
 0x7fe   :  { %3288 = vmatprep.subr.bf16.mxu1 %v3287_v6  ;;  %v3307_v39 = vpack.c.bf16 %v2843_v38, %v2842_v36 }
 0x800   :  { %3111 = vmatmul.mubr.msk.f32.vlgmr.msra.gmra.mrb[16].mxu1 %vm312_vm2, %v3661_v1  ;;  %v3319_v1 = vpack.c.bf16 %v2866_v16, %v2865_v63 }
 0x801   :  { %3131 = vmatprep.mubr.msk.f32.mxu1 %vm51_vm0, %v3494_v11  ;;  %3290 = vmatpush3.bf16.msra.mxu1 %v3287_v6 }
 0x802   :  { %3292 = vmatprep.subr.bf16.mxu1 %v3291_v9 }
 0x805   :  { %3294 = vmatpush3.bf16.msra.mxu1 %v3291_v9 }
 0x806   :  { %3304 = vmatprep.subr.bf16.mxu1 %v3303_v37 }
 0x808   :  { %3132 = vmatmul.mubr.msk.f32.vlgmr.msra.gmra.mrb[18].mxu1 %vm51_vm0, %v3503_v13 }
 0x809   :  { %3153 = vmatprep.mubr.msk.f32.mxu1 %vm51_vm0, %v3494_v11  ;;  %3306 = vmatpush3.bf16.msra.mxu1 %v3303_v37 }
 0x80a   :  { %3308 = vmatprep.subr.bf16.mxu1 %v3307_v39 }
 0x80d   :  { %3310 = vmatpush3.bf16.msra.mxu1 %v3307_v39  ;;  %v2878_v39 = vld [vmem:[%s3891_s7 + $0x3] ss:$0 sm:$0xff] }
 0x80e   :  { %3161 = vmatprep.subr.mxu1 %v3402_v14 }
 0x810   :  { %3154 = vmatmul.mubr.msk.f32.vlgmr.msra.gmra.mrb[20].mxu1 %vm51_vm0, %v3503_v13 }
 0x811   :  { %3163 = vmatprep.mubr.msk.f32.mxu1 %vm3403_vm1, %v3402_v14 }
 0x8cf   :  { %v1064_v10 = vpop.f32.mrb[14].mxu1 }
 0x8d0   :  { %v3102_v17 = vpop.f32.mrb[15].mxu1  ;;  %3115 = vmatprep.mubr.msk.f32.mxu0 %vm312_vm2, %v1064_v10 }
 0x8d3   :  { %v1224_v19 = vpop.f32.mrb[16].mxu1 }
 0x8d4   :  { %v3112_v20 = vpop.f32.mrb[17].mxu1  ;;  %3116 = vmatmul.mubr.msk.f32.vlgmr.msra.gmra.mrb[10].mxu0 %vm312_vm2, %v1224_v19  ;;  %v2858_v19 = vld [vmem:[%s3886_s2 + $0x68] sm:$0xff] }
 0x8d5   :  { %3119 = vmatpush3.msra.mxu0 %v641_v3  ;;  %3120 = vmatprep.mubr.msk.f32.mxu0 %vm312_vm2, %v3564_v49 }
 0x8d6   :  { %3296 = vmatprep.subr.bf16.mxu0 %v3295_v18 }
 0x8db   :  { %v3133_v49 = vpop.f32.mrb[18].mxu1 }
 0x8dc   :  { %3121 = vmatmul.mubr.msk.f32.vlgmr.msra.gmra.mrb[10].mxu0 %vm312_vm2, %v3630_v23  ;;  %v1473_v25 = vpop.f32.mrb[19].mxu1  ;;  %v2837_v23 = vld [vmem:[%s3890_s6 + $0x2] ss:$0 sm:$0xff]  ;;  %v1479_v33 = vadd.f32 %v3133_v49, %v2829_v27 }
 0x8dd   :  { %3298 = vmatpush3.bf16.msra.mxu0 %v3295_v18  ;;  %3142 = vmatprep.mubr.msk.f32.mxu0 %vm51_vm0, %v3494_v11  ;;  %v1474_v30 = vadd.f32 %v2829_v27, %v1473_v25  ;;  %v2857_v18 = vld [vmem:[%s3886_s2 + $0x60] sm:$0xff]  ;;  %v2874_v25 = vld [vmem:[%s3888_s4 + $0x68] sm:$0xff]  ;;  %v2876_v27 = vld [vmem:[%s3888_s4 + $0x78] sm:$0xff] }
 0x8de   :  { %3300 = vmatprep.subr.bf16.mxu0 %v3299_v24  ;;  %v3311_v20 = vpack.c.bf16 %v2858_v19, %v2857_v18  ;;  %v2873_v49 = vld [vmem:[%s3888_s4 + $0x60] sm:$0xff] }
 0x8e1   :  { %3302 = vmatpush3.bf16.msra.mxu0 %v3299_v24  ;;  %v3315_v24 = vpack.c.bf16 %v2860_v22, %v2859_v21  ;;  %v2890_v21 = vld [vmem:[%s3893_s9] ss:$0 sm:$0xff] }
 0x8e2   :  { %3156 = vmatprep.subr.mxu0 %v3402_v14 }
 0x8e3   :  { %v3155_v61 = vpop.f32.mrb[20].mxu1 }
 0x8e4   :  { %3143 = vmatmul.mubr.msk.f32.vlgmr.msra.gmra.mrb[12].mxu0 %vm51_vm0, %v3503_v13  ;;  %v1649_v0 = vpop.f32.mrb[21].mxu1  ;;  %v1655_v2 = vadd.f32 %v3155_v61, %v2845_v62 }
 0x8e5   :  { %3158 = vmatprep.mubr.msk.f32.mxu0 %vm3403_vm1, %v3402_v14  ;;  %v1650_v3 = vadd.f32 %v2845_v62, %v1649_v0 }
 0x8e7   :  { %3162 = vmatpush3.msra.mxu1 %v1650_v3 }
 0x8e8   :  { %3171 = vmatprep.subr.mxu1 %v3402_v14 }
 0x9b7   :  { %v3144_v26 = vpop.f32.mrb[12].mxu0 }
 0x9b8   :  { %v1561_v28 = vpop.f32.mrb[13].mxu0  ;;  %v1567_v32 = vadd.f32 %v3144_v26, %v2837_v23  ;;  %v3327_v26 = vpack.c.bf16 %v2874_v25, %v2873_v49 }
 0x9b9   :  { %v1562_v29 = vadd.f32 %v2837_v23, %v1561_v28  ;;  %v2875_v23 = vld [vmem:[%s3888_s4 + $0x70] sm:$0xff] }
 0x9ba   :  { %v3331_v28 = vpack.c.bf16 %v2876_v27, %v2875_v23 }
 0x9bb   :  { %3157 = vmatpush3.xpose.msk.msra.mxu0 %vm312_vm2, %v1562_v29 }
 0x9bc   :  { %3166 = vmatprep.subr.mxu0 %v3402_v14 }
 0x9be   :  { %3159 = vmatmul.mubr.msk.f32.vlgmr.msra.gmra.mrb[14].mxu0 %vm312_vm2, %v1474_v30  ;;  %v2867_v30 = vld [vmem:[%s3887_s3 + $0x70] sm:$0xff] }
 0x9bf   :  { %3167 = vmatpush3.xpose.msk.msra.mxu0 %vm312_vm2, %v1567_v32  ;;  %3168 = vmatprep.mubr.msk.f32.mxu0 %vm3403_vm1, %v3402_v14  ;;  %v2868_v32 = vld [vmem:[%s3887_s3 + $0x78] sm:$0xff] }
 0x9c0   :  { %3176 = vmatprep.subr.mxu0 %v2854_v48  ;;  %v3323_v34 = vpack.c.bf16 %v2868_v32, %v2867_v30 }
 0x9c2   :  { %3169 = vmatmul.mubr.msk.f32.vlgmr.msra.gmra.mrb[16].mxu0 %vm312_vm2, %v1479_v33 }
 0x9c3   :  { %3177 = vmatpush3.msra.mxu0 %v2854_v48 }
 0x9c4   :  { %3320 = vmatprep.subr.bf16.mxu0 %v3319_v1 }
 0xa91   :  { %v1730_v40 = vpop.f32.mrb[14].mxu0 }
 0xa92   :  { %v1731_v41 = vadd.f32 %v3544_v31, %v1730_v40  ;;  %v3160_v42 = vpop.f32.mrb[15].mxu0 }
 0xa94   :  { %v1734_v43 = vsel %vm312_vm2, %v1731_v41, -inf }
 0xa95   :  { %1735 = vmax.xlane.f32.xlu0 %v1734_v43  ;;  %v1890_v44 = vpop.f32.mrb[16].mxu0 }
 0xa96   :  { %v1891_v45 = vadd.f32 %v3569_v51, %v1890_v44  ;;  %v3170_v46 = vpop.f32.mrb[17].mxu0 }
 0xa98   :  { %v1894_v47 = vsel %vm312_vm2, %v1891_v45, -inf }
 0xa99   :  { %1895 = vmax.xlane.f32.xlu1 %v1894_v47 }
 0xb22   :  { %v1736_v50 = vpop.xlane.xlu0 %1735 }
 0xb23   :  { %v1737_v52 = vsub.f32 %v1731_v41, %v1736_v50 }
 0xb25   :  { %v1738_v53 = vmul.f32 1.442695, %v1737_v52 }
 0xb26   :  { %v1896_v54 = vpop.xlane.xlu1 %1895 }
 0xb27   :  { %3362 = vpow2.f32 %v1738_v53  ;;  %v1897_v55 = vsub.f32 %v1891_v45, %v1896_v54 }
 0xb29   :  { %v1898_v56 = vmul.f32 1.442695, %v1897_v55 }
 0xb2b   :  { %3364 = vpow2.f32 %v1898_v56 }
 0xb31   :  { %v3363_v57 = vpop.eup %3362 }
 0xb32   :  { %v1740_v58 = vsel %vm312_vm2, %v3363_v57, 0.0 }
 0xb33   :  { %1741 = vadd.xlane.f32.xlu0 %v1740_v58 }
 0xb35   :  { %v3365_v59 = vpop.eup %3364 }
 0xb36   :  { %v1900_v60 = vsel %vm312_vm2, %v3365_v59, 0.0 }
 0xb37   :  { %1901 = vadd.xlane.f32.xlu1 %v1900_v60 }
 0xbc0   :  { %v1742_v4 = vpop.xlane.xlu0 %1741 }
 0xbc1   :  { %3366 = vrcp.f32 %v1742_v4 }
 0xbc4   :  { %v1902_v5 = vpop.xlane.xlu1 %1901 }
 0xbc5   :  { %3368 = vrcp.f32 %v1902_v5 }
 0xbcb   :  { %v3367_v6 = vpop.eup %3366 }
 0xbcc   :  { %v1744_v8 = vmul.f32 %v3367_v6, %v3363_v57 }
 0xbce   :  { %v3756_v9 = vadd.f32 %v1744_v8, %v1392_v7  ;;  %3164 = vmatmul.mubr.msk.f32.vlgmr.msra.gmra.mrb[22].mxu1 %vm312_vm2, %v1744_v8 }
 0xbcf   :  { %v3369_v10 = vpop.eup %3368  ;;  %3172 = vmatpush3.msra.mxu1 %v1655_v2  ;;  %3173 = vmatprep.mubr.msk.f32.mxu1 %vm3403_vm1, %v3402_v14 }
 0xbd0   :  { %v1904_v15 = vmul.f32 %v3369_v10, %v3365_v59  ;;  %3312 = vmatprep.subr.bf16.mxu1 %v3311_v20 }
 0xbd2   :  { %v3763_v17 = vadd.f32 %v1904_v15, %v1393_v12  ;;  %3174 = vmatmul.mubr.msk.f32.vlgmr.msra.gmra.mrb[24].mxu1 %vm312_vm2, %v1904_v15 }
 0xbd3   :  { %3189 = vmatprep.mubr.msk.f32.mxu1 %vm51_vm0, %v3494_v11  ;;  %3314 = vmatpush3.bf16.msra.mxu1 %v3311_v20 }
 0xbd4   :  { %3316 = vmatprep.subr.bf16.mxu1 %v3315_v24 }
 0xbd7   :  { %3318 = vmatpush3.bf16.msra.mxu1 %v3315_v24 }
 0xbd8   :  { %3328 = vmatprep.subr.bf16.mxu1 %v3327_v26 }
 0xbda   :  { %3190 = vmatmul.mubr.msk.f32.vlgmr.msra.gmra.mrb[26].mxu1 %vm51_vm0, %v3503_v13 }
 0xbdb   :  { %3211 = vmatprep.mubr.msk.f32.mxu1 %vm51_vm0, %v3494_v11  ;;  %3330 = vmatpush3.bf16.msra.mxu1 %v3327_v26 }
 0xbdc   :  { %3332 = vmatprep.subr.bf16.mxu1 %v3331_v28 }
 0xbdf   :  { %3334 = vmatpush3.bf16.msra.mxu1 %v3331_v28 }
 0xbe0   :  { %3224 = vmatprep.subr.mxu1 %v3402_v14 }
 0xbe2   :  { %3212 = vmatmul.mubr.msk.f32.vlgmr.msra.gmra.mrb[28].mxu1 %vm51_vm0, %v3503_v13 }
 0xbe3   :  { %3226 = vmatprep.mubr.msk.f32.mxu1 %vm3403_vm1, %v3402_v14 }
 0xca1   :  { %v1814_v29 = vpop.f32.mrb[22].mxu1 }
 0xca2   :  { %v3165_v33 = vpop.f32.mrb[23].mxu1  ;;  %3178 = vmatprep.mubr.msk.f32.mxu0 %vm312_vm2, %v1814_v29 }
 0xca5   :  { %v1974_v35 = vpop.f32.mrb[24].mxu1 }
 0xca6   :  { %v3175_v36 = vpop.f32.mrb[25].mxu1  ;;  %3179 = vmatmul.mubr.msk.f32.vlgmr.msra.gmra.mrb[10].mxu0 %vm312_vm2, %v1974_v35 }
 0xca7   :  { %3322 = vmatpush3.bf16.msra.mxu0 %v3319_v1  ;;  %3200 = vmatprep.mubr.msk.f32.mxu0 %vm51_vm0, %v3494_v11  ;;  %v2870_v11 = vld [vmem:[%s3890_s6 + $0x3] ss:$0 sm:$0xff] }
 0xca8   :  { %3324 = vmatprep.subr.bf16.mxu0 %v3323_v34 }
 0xcab   :  { %3326 = vmatpush3.bf16.msra.mxu0 %v3323_v34 }
 0xcac   :  { %3214 = vmatprep.subr.mxu0 %v3402_v14 }
 0xcad   :  { %v3191_v37 = vpop.f32.mrb[26].mxu1 }
 0xcae   :  { %3201 = vmatmul.mubr.msk.f32.vlgmr.msra.gmra.mrb[18].mxu0 %vm51_vm0, %v3503_v13  ;;  %v2144_v38 = vpop.f32.mrb[27].mxu1  ;;  %v2862_v13 = vld [vmem:[%s3889_s5 + $0x3] ss:$0 sm:$0xff] }
 0xcaf   :  { %3216 = vmatprep.mubr.msk.f32.mxu0 %vm3403_vm1, %v3402_v14  ;;  %v2150_v47 = vadd.f32 %v3191_v37, %v2862_v13  ;;  %v2145_v50 = vadd.f32 %v2862_v13, %v2144_v38 }
 0xcb5   :  { %v3213_v40 = vpop.f32.mrb[28].mxu1 }
 0xcb6   :  { %v2326_v41 = vadd.f32 %v3213_v40, %v2878_v39  ;;  %v2320_v42 = vpop.f32.mrb[29].mxu1 }
 0xcb7   :  { %v2321_v52 = vadd.f32 %v2878_v39, %v2320_v42 }
 0xd81   :  { %v3202_v43 = vpop.f32.mrb[18].mxu0 }
 0xd82   :  { %v2238_v44 = vadd.f32 %v3202_v43, %v2870_v11  ;;  %v2232_v45 = vpop.f32.mrb[19].mxu0 }
 0xd83   :  { %v2233_v46 = vadd.f32 %v2870_v11, %v2232_v45 }
 0xd84   :  { %3225 = vmatpush3.xpose.msk.msra.mxu1 %vm312_vm2, %v2238_v44 }
 0xd85   :  { %3215 = vmatpush3.xpose.msk.msra.mxu0 %vm312_vm2, %v2233_v46 }
 0xd86   :  { %3219 = vmatprep.subr.mxu0 %v3402_v14 }
 0xd87   :  { %3227 = vmatmul.mubr.msk.f32.vlgmr.msra.gmra.mrb[30].mxu1 %vm312_vm2, %v2150_v47 }
 0xd88   :  { %3217 = vmatmul.mubr.msk.f32.vlgmr.msra.gmra.mrb[20].mxu0 %vm312_vm2, %v2145_v50 }
 0xd89   :  { %3220 = vmatpush3.msra.mxu0 %v2321_v52  ;;  %3221 = vmatprep.mubr.msk.f32.mxu0 %vm3403_vm1, %v3402_v14 }
 0xd8a   :  { %3229 = vmatprep.subr.mxu0 %v3402_v14 }
 0xe5a   :  { %v2561_v53 = vpop.f32.mrb[30].mxu1 }
 0xe5b   :  { %v2562_v54 = vadd.f32 %v3569_v51, %v2561_v53  ;;  %v2401_v55 = vpop.f32.mrb[20].mxu0  ;;  %v3228_v56 = vpop.f32.mrb[31].mxu1 }
 0xe5c   :  { %v2402_v57 = vadd.f32 %v3544_v31, %v2401_v55  ;;  %v3218_v58 = vpop.f32.mrb[21].mxu0 }
 0xe5d   :  { %v2565_v59 = vsel %vm312_vm2, %v2562_v54, -inf }
 0xe5e   :  { %2566 = vmax.xlane.f32.xlu1 %v2565_v59  ;;  %v2405_v60 = vsel %vm312_vm2, %v2402_v57, -inf }
 0xe5f   :  { %2406 = vmax.xlane.f32.xlu0 %v2405_v60 }
 0xeeb   :  { %v2567_v61 = vpop.xlane.xlu1 %2566 }
 0xeec   :  { %v2568_v62 = vsub.f32 %v2562_v54, %v2567_v61  ;;  %v2407_v0 = vpop.xlane.xlu0 %2406 }
 0xeed   :  { %v2408_v2 = vsub.f32 %v2402_v57, %v2407_v0 }
 0xeee   :  { %v2569_v3 = vmul.f32 1.442695, %v2568_v62 }
 0xeef   :  { %v2409_v4 = vmul.f32 1.442695, %v2408_v2 }
 0xef0   :  { %3370 = vpow2.f32 %v2569_v3 }
 0xef1   :  { %3372 = vpow2.f32 %v2409_v4 }
 0xefa   :  { %v3371_v51 = vpop.eup %3370 }
 0xefb   :  { %v3373_v5 = vpop.eup %3372  ;;  %v2571_v6 = vsel %vm312_vm2, %v3371_v51, 0.0 }
 0xefc   :  { %2572 = vadd.xlane.f32.xlu1 %v2571_v6  ;;  %v2411_v31 = vsel %vm312_vm2, %v3373_v5, 0.0 }
 0xefd   :  { %2412 = vadd.xlane.f32.xlu0 %v2411_v31 }
 0xf89   :  { %v2573_v7 = vpop.xlane.xlu1 %2572 }
 0xf8a   :  { %3374 = vrcp.f32 %v2573_v7  ;;  %v2413_v8 = vpop.xlane.xlu0 %2412 }
 0xf8b   :  { %3376 = vrcp.f32 %v2413_v8 }
 0xf94   :  { %v3375_v10 = vpop.eup %3374 }
 0xf95   :  { %v3377_v12 = vpop.eup %3376  ;;  %v2575_v15 = vmul.f32 %v3375_v10, %v3371_v51 }
 0xf96   :  { %v2415_v48 = vmul.f32 %v3377_v12, %v3373_v5 }
 0xf97   :  { %v2735_v63 = vadd.f32 %v2575_v15, %v3763_v17 }
 0xf98   :  { %v2734_v16 = vadd.f32 %v2415_v48, %v3756_v9  ;;  %3222 = vmatmul.mubr.msk.f32.vlgmr.msra.gmra.mrb[22].mxu0 %vm312_vm2, %v2415_v48  ;;  %v2887_v9 = vld [vmem:[%s3892_s8 + $0x18] sm:$0xff] }
 0xf99   :  { %v2748_v1 = vmul.f32 0.25, %v2735_v63  ;;  %3230 = vmatpush3.msra.mxu0 %v2326_v41  ;;  %3231 = vmatprep.mubr.msk.f32.mxu0 %vm3403_vm1, %v3402_v14 }
 0xf9a   :  { %v2747_v18 = vmul.f32 0.25, %v2734_v16  ;;  %3234 = vmatprep.subr.mxu0 %v2887_v9 }
 0xf9b   :  { %2750 = vst.msk [vmem:[%s3895_s11 + $0x8] sm:$0xff] %vm312_vm2, %v2748_v1 }
 0xf9c   :  { %2749 = vst.msk [vmem:[%s3895_s11] sm:$0xff] %vm312_vm2, %v2747_v18  ;;  %3232 = vmatmul.mubr.msk.f32.vlgmr.msra.gmra.mrb[24].mxu0 %vm312_vm2, %v2575_v15  ;;  %s3404_s11 = smov [#allocation2]  }
 0xf9d   :  { %3235 = vmatpush3.msra.mxu0 %v2887_v9  ;;  %s2756_s28 = sshll.u32 %s3404_s11, 4  ;;  %s2757_s28 = int_to_ptr.vmem [resolvable:$true] %s2756_s28 }
 0xf9e   :  { %s3378_s8 = scalar_lea.vmem %s2757_s28, 256  ;;  %p3383_p1 = scmp.lt.s32.totalorder %s2757_s28, %s2757_s28 }
 0xf9f   :  { %p3379_p0 = scmp.ne.s32.totalorder %s2757_s28, %s3378_s8  ;;  %p3384_p2 = scmp.lt.s32.totalorder %s3378_s8, %s3378_s8 }
 0xfa1   :  { %p3385_p3 = por %p3384_p2, %p3383_p1 }
 0xfa3   :  { %p3386_p4 = pnand %p3385_p3, %p3379_p0 }
0x106b   :  { %v2485_v14 = vpop.f32.mrb[22].mxu0 }
0x106c   :  { %v3223_v17 = vpop.f32.mrb[23].mxu0  ;;  %3236 = vmatprep.mubr.msk.f32.mxu0 %vm312_vm2, %v2485_v14 }
0x106f   :  { %v2645_v19 = vpop.f32.mrb[24].mxu0 }
0x1070   :  { %v3233_v20 = vpop.f32.mrb[25].mxu0  ;;  %3237 = vmatmul.mubr.msk.f32.vlgmr.msra.gmra.mrb[10].mxu0 %vm312_vm2, %v2645_v19 }
0x1143   :  { %v3238_v22 = vpop.f32.mrb[10].mxu0 }
0x1144   :  { %v2744_v24 = vadd.f32 %v3238_v22, %v2890_v21  ;;  %v2723_v49 = vpop.f32.mrb[11].mxu0 }
0x1145   :  { %v2743_v25 = vadd.f32 %v2890_v21, %v2723_v49 }
0x1146   :  { %2746 = vst.msk [vmem:[#allocation2 + $0x8] sm:$0xff] %vm51_vm0, %v2744_v24 }
0x1147   :  { %2745 = vst.msk [vmem:[#allocation2] sm:$0xff] %vm51_vm0, %v2743_v25 }
0x1148   :  { %3389 = shalt.err (!%p3386_p4)
}
0x1149   :  { %s3390_s30 = scalar_lea.hbm %s3894_s10, 256 }
0x114a   :  { %p3391_p5 = scmp.ne.s32.totalorder %s3894_s10, %s3390_s30  ;;  %p3394_p6 = scmp.lt.u32.totalorder %s3390_s30, %s3894_s10 }
0x114c   :  { %p3396_p7 = pnand %p3394_p6, %p3391_p5 }
0x114e   :  { %3399 = shalt.err (!%p3396_p7)
}
0x114f   :  { %s3405_s16 = smov 128   ;;  %s3406_s17 = smov 8  }
0x1150   :  { %2762 = dma.vmem_to_hbm [thread:$0]  %s2757_s28, 256, %s3894_s10, [#allocation3], %s3405_s16, %s3405_s16, %s3406_s17  }
0x1151   :  { %3400 = dma.done.wait [#allocation3], 256  }
0x1152   :  { %3401 = vsyncadd [#allocation3], 4294967040 }
0x1153   :  { %2770 = vsyncpa [#allocation3], 1 }

</bundles_post_ra>
